<compile_context>
chip_gen: v6e
topology: v6e:2x2x1
jax: 0.10.0
libtpu: 0.0.40
codegen_flags: <defaults>
</compile_context>

<pallas_src>
import functools

import numpy as np
import jax
import jax.numpy as jnp
from jax.experimental import pallas as pl
from jax.experimental.pallas import tpu as pltpu

NUM_HEADS = 8  # hard-coded by the module's .view(batch, N, 3, 8, -1)


def _attention_kernel(x_ref, wqkv_ref, bqkv_ref, w0_ref, b0_ref, o_ref,
                      attn_ref, *, num_heads, scale, mm_dtype, approx_recip,
                      fuse_w0):
    # x_ref:    (N, C)   VMEM, already in mm_dtype (cast hoisted to wrapper)
    # wqkv_ref: (C, 3C)  VMEM resident (single copy), mm_dtype
    # bqkv_ref: (1, 3C)  VMEM resident, f32
    # w0_ref:   (C, C)   VMEM resident (single copy), mm_dtype
    # b0_ref:   (1, C)   VMEM resident, f32
    # o_ref:    (N, C)   VMEM
    # attn_ref: (N, C)   VMEM scratch (only used when fuse_w0 is False)
    x = x_ref[...]
    n, c = x.shape
    dh = c // num_heads

    # --- fused QKV projection: one big lane-dense MXU matmul ----------------
    qkv = jnp.dot(x, wqkv_ref[...], preferred_element_type=jnp.float32)
    qkv = qkv + bqkv_ref[...]                       # (N, 3C) f32
    # Dropout(drop1=0.0) -> identity.

    # Module divides scores by d = dh**-0.5, i.e. multiplies by sqrt(dh).
    # Fold that into q once on (N, C) instead of on every (N, N) score matrix.
    q_all = (qkv[:, :c] * scale).astype(mm_dtype)
    k_all = qkv[:, c:2 * c].astype(mm_dtype)
    v_all = qkv[:, 2 * c:].astype(mm_dtype)

    # --- per-head attention (heads statically unrolled) ---------------------
    out_acc = None
    for h in range(num_heads):
        lo, hi = h * dh, (h + 1) * dh
        q = q_all[:, lo:hi]                          # (N, dh)
        k = k_all[:, lo:hi]
        v = v_all[:, lo:hi]

        # scores = (q*sqrt(dh)) @ k^T, expressed as a contraction (no transpose)
        s = jax.lax.dot_general(q, k, (((1,), (1,)), ((), ())),
                                preferred_element_type=jnp.float32)  # (N, N)

        # numerically-stable softmax; normalization deferred to after PV:
        # one EUP reciprocal + (N, dh) multiply instead of an (N, N) divide.
        m = jnp.max(s, axis=-1, keepdims=True)
        p = jnp.exp(s - m)
        inv_l = pl.reciprocal(jnp.sum(p, axis=-1, keepdims=True),
                              approx=approx_recip)

        ho = jnp.dot(p.astype(mm_dtype), v,
                     preferred_element_type=jnp.float32)             # (N, dh)
        ho = (ho * inv_l).astype(mm_dtype)

        if fuse_w0:
            # dh is a multiple of 128: fuse merge-heads + output projection by
            # accumulating head_out @ W0[h*dh:(h+1)*dh, :] (no concatenate, no
            # extra live (N, C) buffer).
            part = jnp.dot(ho, w0_ref[lo:hi, :],
                           preferred_element_type=jnp.float32)
            out_acc = part if out_acc is None else out_acc + part
        else:
            # dh < 128: write the head output straight into its lane slice of
            # the (N, C) VMEM scratch (no lane-dim concatenate / relayout).
            attn_ref[:, lo:hi] = ho

    # --- output projection W0 ------------------------------------------------
    if not fuse_w0:
        out_acc = jnp.dot(attn_ref[...], w0_ref[...],
                          preferred_element_type=jnp.float32)
    out = out_acc + b0_ref[...]
    # Dropout(drop2=0.0) -> identity.
    o_ref[...] = out.astype(o_ref.dtype)


@functools.partial(jax.jit, static_argnames=("num_heads", "bf16_matmul"))
def attentione_forward(x, w_qkv, b_qkv, w0, b0, *, num_heads=NUM_HEADS,
                       bf16_matmul=True):
    """x: [B, N, C].  Weights stored as [in, out] (transposed vs. PyTorch)."""
    B, N, C = x.shape
    assert C % num_heads == 0, "dim must be divisible by the number of heads"
    dh = C // num_heads
    # Module: d = (dim/head_num)**(-0.5); scores are DIVIDED by d, i.e.
    # multiplied by sqrt(head_dim).
    scale = float((C / num_heads) ** 0.5)

    out_dtype = x.dtype
    mm_dtype = jnp.bfloat16 if bf16_matmul else x.dtype

    # Hoisted casts: weights / activations are cast ONCE here, so the kernel
    # never re-casts the resident weights per grid step and the bf16 path
    # halves the weight DMA + resident VMEM.  Biases stay f32 (added in f32).
    x_in = x.astype(mm_dtype)
    w_qkv_in = w_qkv.astype(mm_dtype)
    w0_in = w0.astype(mm_dtype)
    b_qkv_in = b_qkv.astype(jnp.float32).reshape(1, 3 * C)
    b0_in = b0.astype(jnp.float32).reshape(1, C)

    fuse_w0 = (dh % 128 == 0)
    approx_recip = bool(bf16_matmul)   # exact reciprocal on the strict f32 path

    kernel = functools.partial(_attention_kernel, num_heads=num_heads,
                               scale=scale, mm_dtype=mm_dtype,
                               approx_recip=approx_recip, fuse_w0=fuse_w0)

    mm_is = int(jnp.dtype(mm_dtype).itemsize)
    out_is = int(jnp.dtype(out_dtype).itemsize)

    flops = (2 * B * N * C * (3 * C)                 # QKV projection
             + 2 * B * num_heads * N * N * dh * 2    # q@k^T and p@v
             + 2 * B * N * C * C)                    # output projection
    bytes_accessed = (mm_is * (x_in.size + w_qkv_in.size + w0_in.size)
                      + 4 * (b_qkv_in.size + b0_in.size)
                      + out_is * B * N * C)
    cost = pl.CostEstimate(flops=int(flops),
                           transcendentals=int(B * num_heads * (N * N + N)),
                           bytes_accessed=int(bytes_accessed))

    # --- VMEM budget (always passed; capped by physical capacity) -----------
    resident = (mm_is * (w_qkv_in.size + w0_in.size)
                + 4 * (b_qkv_in.size + b0_in.size))          # single-buffered
    io_blocks = 2 * mm_is * N * C + 2 * out_is * N * C        # pipelined x / out
    acts = (4 * N * 3 * C                 # qkv f32
            + 3 * mm_is * N * C           # q/k/v slabs in mm_dtype
            + 2 * 2 * 4 * N * N           # s & p f32 (live-range slack)
            + 4 * N * dh                  # head output f32
            + mm_is * N * C               # attn scratch
            + 4 * N * C)                  # f32 output accumulator
    vmem_needed = resident + io_blocks + acts
    try:
        vmem_cap = int(pltpu.get_tpu_info().vmem_capacity_bytes)
    except Exception:  # pragma: no cover - conservative fallback (v7x = 64 MiB)
        vmem_cap = 64 * 1024 * 1024
    vmem_limit = int(min(max(int(vmem_needed * 1.5), 32 * 1024 * 1024),
                         int(vmem_cap * 0.85)))
    # TODO(synk): if vmem_needed exceeds the physical cap (very large dim / N),
    #             stream W_qkv / W0 over an "arbitrary" grid axis and tile the
    #             q rows flash-style instead of keeping everything resident.

    return pl.pallas_call(
        kernel,
        out_shape=jax.ShapeDtypeStruct((B, N, C), out_dtype),
        grid_spec=pltpu.PrefetchScalarGridSpec(
            num_scalar_prefetch=0,
            grid=(B,),
            in_specs=[
                # per-batch lane-dense (N, C) block; leading dim squeezed away
                pl.BlockSpec((pl.Squeezed(), N, C), lambda b: (b, 0, 0)),
                # resident weights/biases: whole-array VMEM placement (single
                # copy, no per-step double-buffered DMA — index never changes)
                pl.BlockSpec(memory_space=pltpu.MemorySpace.VMEM),  # W_qkv
                pl.BlockSpec(memory_space=pltpu.MemorySpace.VMEM),  # b_qkv
                pl.BlockSpec(memory_space=pltpu.MemorySpace.VMEM),  # W0
                pl.BlockSpec(memory_space=pltpu.MemorySpace.VMEM),  # b0
            ],
            out_specs=pl.BlockSpec((pl.Squeezed(), N, C), lambda b: (b, 0, 0)),
            scratch_shapes=[pltpu.VMEM((N, C), mm_dtype)],
        ),
        compiler_params=pltpu.CompilerParams(
            dimension_semantics=("parallel",),
            vmem_limit_bytes=vmem_limit,
        ),
        cost_estimate=cost,
    )(x_in, w_qkv_in, b_qkv_in, w0_in, b0_in)


def init_params(key, dim):
    """PyTorch nn.Linear-style uniform init, stored as [in, out]."""
    k1, k2, k3, k4 = jax.random.split(key, 4)
    bound = 1.0 / (dim ** 0.5)
    w_qkv = jax.random.uniform(k1, (dim, 3 * dim), jnp.float32, -bound, bound)
    b_qkv = jax.random.uniform(k2, (1, 3 * dim), jnp.float32, -bound, bound)
    w0 = jax.random.uniform(k3, (dim, dim), jnp.float32, -bound, bound)
    b0 = jax.random.uniform(k4, (1, dim), jnp.float32, -bound, bound)
    return w_qkv, b_qkv, w0, b0


if __name__ == "__main__":
    key = jax.random.PRNGKey(0)
    kx, kp = jax.random.split(key)

    # Small but lane-dense test shapes: C = 128 (one full lane register wide).
    B, N, C = 2, 16, 128
    H, Dh = NUM_HEADS, C // NUM_HEADS

    x = jax.random.normal(kx, (B, N, C), jnp.float32)
    w_qkv, b_qkv, w0, b0 = init_params(kp, C)

    # Strict f32 path first (matches the f32 module numerics tightly).
    out = jax.block_until_ready(
        attentione_forward(x, w_qkv, b_qkv, w0, b0, bf16_matmul=False))

    # ---- host-side float64 reference replicating the PyTorch forward ------
    xn = np.asarray(x, np.float64)
    w1n, b1n = np.asarray(w_qkv, np.float64), np.asarray(b_qkv, np.float64)
    w2n, b2n = np.asarray(w0, np.float64), np.asarray(b0, np.float64)

    qkv = xn @ w1n + b1n                                     # (B, N, 3C)
    QKV = qkv.reshape(B, N, 3, H, Dh).transpose(2, 0, 3, 1, 4)
    q, k, v = QKV[0], QKV[1], QKV[2]
    d = (C / H) ** (-0.5)
    s = (q @ np.swapaxes(k, -1, -2)) / d                     # divide by d (!)
    s = s - s.max(-1, keepdims=True)
    p = np.exp(s)
    p = p / p.sum(-1, keepdims=True)
    att = (p @ v).transpose(0, 2, 1, 3).reshape(B, N, C)
    ref = att @ w2n + b2n

    assert out.shape == (B, N, C)
    assert np.allclose(np.asarray(out, np.float64), ref, atol=5e-3, rtol=5e-3), \
        float(np.max(np.abs(np.asarray(out, np.float64) - ref)))

    # ---- default bf16-MXU fast path (f32 accumulation), looser numerics ----
    out_bf16 = jax.block_until_ready(
        attentione_forward(x, w_qkv, b_qkv, w0, b0))
    assert float(np.max(np.abs(np.asarray(out_bf16, np.float64) - ref))) < 0.15

    print("KERNEL_OK")
</pallas_src>

<mosaic_0001>
module attributes {stable_mosaic.version = 11 : i64} {
  func.func @_attention_kernel(%arg0: i32, %arg1: memref<1x16x128xf32, #tpu.memory_space<vmem>>, %arg2: memref<128x384xf32, #tpu.memory_space<vmem>>, %arg3: memref<1x384xf32, #tpu.memory_space<vmem>>, %arg4: memref<128x128xf32, #tpu.memory_space<vmem>>, %arg5: memref<1x128xf32, #tpu.memory_space<vmem>>, %arg6: memref<1x16x128xf32, #tpu.memory_space<vmem>>, %arg7: memref<16x128xf32, #tpu.memory_space<vmem>>) attributes {dimension_semantics = [#tpu.dimension_semantics<parallel>], iteration_bounds = array<i64: 2>, scalar_prefetch = 0 : i64, scratch_operands = 1 : i64, tpu.core_type = #tpu.core_type<tc>, window_params = [{transform_indices = @transform_0, window_bounds = array<i64: 1, 16, 128>}, {pipeline_mode = #tpu.pipeline_mode<synchronous>, transform_indices = @transform_1, window_bounds = array<i64: 128, 384>}, {pipeline_mode = #tpu.pipeline_mode<synchronous>, transform_indices = @transform_2, window_bounds = array<i64: 1, 384>}, {pipeline_mode = #tpu.pipeline_mode<synchronous>, transform_indices = @transform_3, window_bounds = array<i64: 128, 128>}, {pipeline_mode = #tpu.pipeline_mode<synchronous>, transform_indices = @transform_4, window_bounds = array<i64: 1, 128>}, {transform_indices = @transform_5, window_bounds = array<i64: 1, 16, 128>}]} {
    %c0 = arith.constant 0 : index
    %c0_0 = arith.constant 0 : index
    %c0_1 = arith.constant 0 : index
    %0 = vector.load %arg1[%c0, %c0_0, %c0_1] : memref<1x16x128xf32, #tpu.memory_space<vmem>>, vector<1x16x128xf32>
    %1 = vector.shape_cast %0 : vector<1x16x128xf32> to vector<16x128xf32>
    %c0_2 = arith.constant 0 : index
    %c0_3 = arith.constant 0 : index
    %2 = vector.load %arg2[%c0_2, %c0_3] : memref<128x384xf32, #tpu.memory_space<vmem>>, vector<128x384xf32>
    %cst = arith.constant dense<0.000000e+00> : vector<16x384xf32>
    %3 = tpu.matmul %1, %2, %cst {dimension_numbers = #tpu.dot_dimension_numbers<[1], [0], [0], [1], [0, 0, 1, 1], [], []>} : vector<16x128xf32>, vector<128x384xf32>, vector<16x384xf32> -> vector<16x384xf32>
    %c0_4 = arith.constant 0 : index
    %c0_5 = arith.constant 0 : index
    %4 = vector.load %arg3[%c0_4, %c0_5] : memref<1x384xf32, #tpu.memory_space<vmem>>, vector<1x384xf32>
    %5 = vector.broadcast %4 : vector<1x384xf32> to vector<16x384xf32>
    %6 = arith.addf %3, %5 : vector<16x384xf32>
    %7 = vector.extract_strided_slice %6 {offsets = [0, 0], sizes = [16, 128], strides = [1, 1]} : vector<16x384xf32> to vector<16x128xf32>
    %cst_6 = arith.constant 4.000000e+00 : f32
    %8 = vector.broadcast %cst_6 : f32 to vector<16x128xf32>
    %9 = arith.mulf %7, %8 : vector<16x128xf32>
    %10 = vector.extract_strided_slice %6 {offsets = [0, 128], sizes = [16, 128], strides = [1, 1]} : vector<16x384xf32> to vector<16x128xf32>
    %11 = vector.extract_strided_slice %6 {offsets = [0, 256], sizes = [16, 128], strides = [1, 1]} : vector<16x384xf32> to vector<16x128xf32>
    %12 = vector.extract_strided_slice %9 {offsets = [0, 0], sizes = [16, 16], strides = [1, 1]} : vector<16x128xf32> to vector<16x16xf32>
    %13 = vector.extract_strided_slice %10 {offsets = [0, 0], sizes = [16, 16], strides = [1, 1]} : vector<16x128xf32> to vector<16x16xf32>
    %14 = vector.extract_strided_slice %11 {offsets = [0, 0], sizes = [16, 16], strides = [1, 1]} : vector<16x128xf32> to vector<16x16xf32>
    %cst_7 = arith.constant dense<0.000000e+00> : vector<16x16xf32>
    %15 = tpu.matmul %12, %13, %cst_7 {dimension_numbers = #tpu.dot_dimension_numbers<[1], [1], [0], [0], [0, 0, 1, 0], [], []>} : vector<16x16xf32>, vector<16x16xf32>, vector<16x16xf32> -> vector<16x16xf32>
    %cst_8 = arith.constant dense<0xFF800000> : vector<16xf32>
    %16 = vector.multi_reduction <maximumf>, %15, %cst_8 [1] : vector<16x16xf32> to vector<16xf32>
    %17 = vector.shape_cast %16 : vector<16xf32> to vector<16x1xf32>
    %18 = vector.broadcast %17 : vector<16x1xf32> to vector<16x16xf32>
    %19 = arith.subf %15, %18 : vector<16x16xf32>
    %20 = math.exp %19 : vector<16x16xf32>
    %cst_9 = arith.constant dense<0.000000e+00> : vector<16xf32>
    %21 = vector.multi_reduction <add>, %20, %cst_9 [1] : vector<16x16xf32> to vector<16xf32>
    %22 = vector.shape_cast %21 : vector<16xf32> to vector<16x1xf32>
    %23 = tpu.reciprocal %22 : vector<16x1xf32> -> vector<16x1xf32>
    %cst_10 = arith.constant dense<0.000000e+00> : vector<16x16xf32>
    %24 = tpu.matmul %20, %14, %cst_10 {dimension_numbers = #tpu.dot_dimension_numbers<[1], [0], [0], [1], [0, 0, 1, 1], [], []>} : vector<16x16xf32>, vector<16x16xf32>, vector<16x16xf32> -> vector<16x16xf32>
    %25 = vector.broadcast %23 : vector<16x1xf32> to vector<16x16xf32>
    %26 = arith.mulf %24, %25 : vector<16x16xf32>
    %c0_11 = arith.constant 0 : index
    %c0_12 = arith.constant 0 : index
    %27 = vector.load %arg7[%c0_11, %c0_12] : memref<16x128xf32, #tpu.memory_space<vmem>>, vector<16x16xf32>
    tpu.vector_store %arg7[%c0_11, %c0_12], %26 {strides = array<i32>} : memref<16x128xf32, #tpu.memory_space<vmem>>, vector<16x16xf32>,
    %28 = vector.extract_strided_slice %9 {offsets = [0, 16], sizes = [16, 16], strides = [1, 1]} : vector<16x128xf32> to vector<16x16xf32>
    %29 = vector.extract_strided_slice %10 {offsets = [0, 16], sizes = [16, 16], strides = [1, 1]} : vector<16x128xf32> to vector<16x16xf32>
    %30 = vector.extract_strided_slice %11 {offsets = [0, 16], sizes = [16, 16], strides = [1, 1]} : vector<16x128xf32> to vector<16x16xf32>
    %cst_13 = arith.constant dense<0.000000e+00> : vector<16x16xf32>
    %31 = tpu.matmul %28, %29, %cst_13 {dimension_numbers = #tpu.dot_dimension_numbers<[1], [1], [0], [0], [0, 0, 1, 0], [], []>} : vector<16x16xf32>, vector<16x16xf32>, vector<16x16xf32> -> vector<16x16xf32>
    %cst_14 = arith.constant dense<0xFF800000> : vector<16xf32>
    %32 = vector.multi_reduction <maximumf>, %31, %cst_14 [1] : vector<16x16xf32> to vector<16xf32>
    %33 = vector.shape_cast %32 : vector<16xf32> to vector<16x1xf32>
    %34 = vector.broadcast %33 : vector<16x1xf32> to vector<16x16xf32>
    %35 = arith.subf %31, %34 : vector<16x16xf32>
    %36 = math.exp %35 : vector<16x16xf32>
    %cst_15 = arith.constant dense<0.000000e+00> : vector<16xf32>
    %37 = vector.multi_reduction <add>, %36, %cst_15 [1] : vector<16x16xf32> to vector<16xf32>
    %38 = vector.shape_cast %37 : vector<16xf32> to vector<16x1xf32>
    %39 = tpu.reciprocal %38 : vector<16x1xf32> -> vector<16x1xf32>
    %cst_16 = arith.constant dense<0.000000e+00> : vector<16x16xf32>
    %40 = tpu.matmul %36, %30, %cst_16 {dimension_numbers = #tpu.dot_dimension_numbers<[1], [0], [0], [1], [0, 0, 1, 1], [], []>} : vector<16x16xf32>, vector<16x16xf32>, vector<16x16xf32> -> vector<16x16xf32>
    %41 = vector.broadcast %39 : vector<16x1xf32> to vector<16x16xf32>
    %42 = arith.mulf %40, %41 : vector<16x16xf32>
    %c0_17 = arith.constant 0 : index
    %c16 = arith.constant 16 : index
    %43 = vector.load %arg7[%c0_17, %c16] : memref<16x128xf32, #tpu.memory_space<vmem>>, vector<16x16xf32>
    tpu.vector_store %arg7[%c0_17, %c16], %42 {strides = array<i32>} : memref<16x128xf32, #tpu.memory_space<vmem>>, vector<16x16xf32>,
    %44 = vector.extract_strided_slice %9 {offsets = [0, 32], sizes = [16, 16], strides = [1, 1]} : vector<16x128xf32> to vector<16x16xf32>
    %45 = vector.extract_strided_slice %10 {offsets = [0, 32], sizes = [16, 16], strides = [1, 1]} : vector<16x128xf32> to vector<16x16xf32>
    %46 = vector.extract_strided_slice %11 {offsets = [0, 32], sizes = [16, 16], strides = [1, 1]} : vector<16x128xf32> to vector<16x16xf32>
    %cst_18 = arith.constant dense<0.000000e+00> : vector<16x16xf32>
    %47 = tpu.matmul %44, %45, %cst_18 {dimension_numbers = #tpu.dot_dimension_numbers<[1], [1], [0], [0], [0, 0, 1, 0], [], []>} : vector<16x16xf32>, vector<16x16xf32>, vector<16x16xf32> -> vector<16x16xf32>
    %cst_19 = arith.constant dense<0xFF800000> : vector<16xf32>
    %48 = vector.multi_reduction <maximumf>, %47, %cst_19 [1] : vector<16x16xf32> to vector<16xf32>
    %49 = vector.shape_cast %48 : vector<16xf32> to vector<16x1xf32>
    %50 = vector.broadcast %49 : vector<16x1xf32> to vector<16x16xf32>
    %51 = arith.subf %47, %50 : vector<16x16xf32>
    %52 = math.exp %51 : vector<16x16xf32>
    %cst_20 = arith.constant dense<0.000000e+00> : vector<16xf32>
    %53 = vector.multi_reduction <add>, %52, %cst_20 [1] : vector<16x16xf32> to vector<16xf32>
    %54 = vector.shape_cast %53 : vector<16xf32> to vector<16x1xf32>
    %55 = tpu.reciprocal %54 : vector<16x1xf32> -> vector<16x1xf32>
    %cst_21 = arith.constant dense<0.000000e+00> : vector<16x16xf32>
    %56 = tpu.matmul %52, %46, %cst_21 {dimension_numbers = #tpu.dot_dimension_numbers<[1], [0], [0], [1], [0, 0, 1, 1], [], []>} : vector<16x16xf32>, vector<16x16xf32>, vector<16x16xf32> -> vector<16x16xf32>
    %57 = vector.broadcast %55 : vector<16x1xf32> to vector<16x16xf32>
    %58 = arith.mulf %56, %57 : vector<16x16xf32>
    %c0_22 = arith.constant 0 : index
    %c32 = arith.constant 32 : index
    %59 = vector.load %arg7[%c0_22, %c32] : memref<16x128xf32, #tpu.memory_space<vmem>>, vector<16x16xf32>
    tpu.vector_store %arg7[%c0_22, %c32], %58 {strides = array<i32>} : memref<16x128xf32, #tpu.memory_space<vmem>>, vector<16x16xf32>,
    %60 = vector.extract_strided_slice %9 {offsets = [0, 48], sizes = [16, 16], strides = [1, 1]} : vector<16x128xf32> to vector<16x16xf32>
    %61 = vector.extract_strided_slice %10 {offsets = [0, 48], sizes = [16, 16], strides = [1, 1]} : vector<16x128xf32> to vector<16x16xf32>
    %62 = vector.extract_strided_slice %11 {offsets = [0, 48], sizes = [16, 16], strides = [1, 1]} : vector<16x128xf32> to vector<16x16xf32>
    %cst_23 = arith.constant dense<0.000000e+00> : vector<16x16xf32>
    %63 = tpu.matmul %60, %61, %cst_23 {dimension_numbers = #tpu.dot_dimension_numbers<[1], [1], [0], [0], [0, 0, 1, 0], [], []>} : vector<16x16xf32>, vector<16x16xf32>, vector<16x16xf32> -> vector<16x16xf32>
    %cst_24 = arith.constant dense<0xFF800000> : vector<16xf32>
    %64 = vector.multi_reduction <maximumf>, %63, %cst_24 [1] : vector<16x16xf32> to vector<16xf32>
    %65 = vector.shape_cast %64 : vector<16xf32> to vector<16x1xf32>
    %66 = vector.broadcast %65 : vector<16x1xf32> to vector<16x16xf32>
    %67 = arith.subf %63, %66 : vector<16x16xf32>
    %68 = math.exp %67 : vector<16x16xf32>
    %cst_25 = arith.constant dense<0.000000e+00> : vector<16xf32>
    %69 = vector.multi_reduction <add>, %68, %cst_25 [1] : vector<16x16xf32> to vector<16xf32>
    %70 = vector.shape_cast %69 : vector<16xf32> to vector<16x1xf32>
    %71 = tpu.reciprocal %70 : vector<16x1xf32> -> vector<16x1xf32>
    %cst_26 = arith.constant dense<0.000000e+00> : vector<16x16xf32>
    %72 = tpu.matmul %68, %62, %cst_26 {dimension_numbers = #tpu.dot_dimension_numbers<[1], [0], [0], [1], [0, 0, 1, 1], [], []>} : vector<16x16xf32>, vector<16x16xf32>, vector<16x16xf32> -> vector<16x16xf32>
    %73 = vector.broadcast %71 : vector<16x1xf32> to vector<16x16xf32>
    %74 = arith.mulf %72, %73 : vector<16x16xf32>
    %c0_27 = arith.constant 0 : index
    %c48 = arith.constant 48 : index
    %75 = vector.load %arg7[%c0_27, %c48] : memref<16x128xf32, #tpu.memory_space<vmem>>, vector<16x16xf32>
    tpu.vector_store %arg7[%c0_27, %c48], %74 {strides = array<i32>} : memref<16x128xf32, #tpu.memory_space<vmem>>, vector<16x16xf32>,
    %76 = vector.extract_strided_slice %9 {offsets = [0, 64], sizes = [16, 16], strides = [1, 1]} : vector<16x128xf32> to vector<16x16xf32>
    %77 = vector.extract_strided_slice %10 {offsets = [0, 64], sizes = [16, 16], strides = [1, 1]} : vector<16x128xf32> to vector<16x16xf32>
    %78 = vector.extract_strided_slice %11 {offsets = [0, 64], sizes = [16, 16], strides = [1, 1]} : vector<16x128xf32> to vector<16x16xf32>
    %cst_28 = arith.constant dense<0.000000e+00> : vector<16x16xf32>
    %79 = tpu.matmul %76, %77, %cst_28 {dimension_numbers = #tpu.dot_dimension_numbers<[1], [1], [0], [0], [0, 0, 1, 0], [], []>} : vector<16x16xf32>, vector<16x16xf32>, vector<16x16xf32> -> vector<16x16xf32>
    %cst_29 = arith.constant dense<0xFF800000> : vector<16xf32>
    %80 = vector.multi_reduction <maximumf>, %79, %cst_29 [1] : vector<16x16xf32> to vector<16xf32>
    %81 = vector.shape_cast %80 : vector<16xf32> to vector<16x1xf32>
    %82 = vector.broadcast %81 : vector<16x1xf32> to vector<16x16xf32>
    %83 = arith.subf %79, %82 : vector<16x16xf32>
    %84 = math.exp %83 : vector<16x16xf32>
    %cst_30 = arith.constant dense<0.000000e+00> : vector<16xf32>
    %85 = vector.multi_reduction <add>, %84, %cst_30 [1] : vector<16x16xf32> to vector<16xf32>
    %86 = vector.shape_cast %85 : vector<16xf32> to vector<16x1xf32>
    %87 = tpu.reciprocal %86 : vector<16x1xf32> -> vector<16x1xf32>
    %cst_31 = arith.constant dense<0.000000e+00> : vector<16x16xf32>
    %88 = tpu.matmul %84, %78, %cst_31 {dimension_numbers = #tpu.dot_dimension_numbers<[1], [0], [0], [1], [0, 0, 1, 1], [], []>} : vector<16x16xf32>, vector<16x16xf32>, vector<16x16xf32> -> vector<16x16xf32>
    %89 = vector.broadcast %87 : vector<16x1xf32> to vector<16x16xf32>
    %90 = arith.mulf %88, %89 : vector<16x16xf32>
    %c0_32 = arith.constant 0 : index
    %c64 = arith.constant 64 : index
    %91 = vector.load %arg7[%c0_32, %c64] : memref<16x128xf32, #tpu.memory_space<vmem>>, vector<16x16xf32>
    tpu.vector_store %arg7[%c0_32, %c64], %90 {strides = array<i32>} : memref<16x128xf32, #tpu.memory_space<vmem>>, vector<16x16xf32>,
    %92 = vector.extract_strided_slice %9 {offsets = [0, 80], sizes = [16, 16], strides = [1, 1]} : vector<16x128xf32> to vector<16x16xf32>
    %93 = vector.extract_strided_slice %10 {offsets = [0, 80], sizes = [16, 16], strides = [1, 1]} : vector<16x128xf32> to vector<16x16xf32>
    %94 = vector.extract_strided_slice %11 {offsets = [0, 80], sizes = [16, 16], strides = [1, 1]} : vector<16x128xf32> to vector<16x16xf32>
    %cst_33 = arith.constant dense<0.000000e+00> : vector<16x16xf32>
    %95 = tpu.matmul %92, %93, %cst_33 {dimension_numbers = #tpu.dot_dimension_numbers<[1], [1], [0], [0], [0, 0, 1, 0], [], []>} : vector<16x16xf32>, vector<16x16xf32>, vector<16x16xf32> -> vector<16x16xf32>
    %cst_34 = arith.constant dense<0xFF800000> : vector<16xf32>
    %96 = vector.multi_reduction <maximumf>, %95, %cst_34 [1] : vector<16x16xf32> to vector<16xf32>
    %97 = vector.shape_cast %96 : vector<16xf32> to vector<16x1xf32>
    %98 = vector.broadcast %97 : vector<16x1xf32> to vector<16x16xf32>
    %99 = arith.subf %95, %98 : vector<16x16xf32>
    %100 = math.exp %99 : vector<16x16xf32>
    %cst_35 = arith.constant dense<0.000000e+00> : vector<16xf32>
    %101 = vector.multi_reduction <add>, %100, %cst_35 [1] : vector<16x16xf32> to vector<16xf32>
    %102 = vector.shape_cast %101 : vector<16xf32> to vector<16x1xf32>
    %103 = tpu.reciprocal %102 : vector<16x1xf32> -> vector<16x1xf32>
    %cst_36 = arith.constant dense<0.000000e+00> : vector<16x16xf32>
    %104 = tpu.matmul %100, %94, %cst_36 {dimension_numbers = #tpu.dot_dimension_numbers<[1], [0], [0], [1], [0, 0, 1, 1], [], []>} : vector<16x16xf32>, vector<16x16xf32>, vector<16x16xf32> -> vector<16x16xf32>
    %105 = vector.broadcast %103 : vector<16x1xf32> to vector<16x16xf32>
    %106 = arith.mulf %104, %105 : vector<16x16xf32>
    %c0_37 = arith.constant 0 : index
    %c80 = arith.constant 80 : index
    %107 = vector.load %arg7[%c0_37, %c80] : memref<16x128xf32, #tpu.memory_space<vmem>>, vector<16x16xf32>
    tpu.vector_store %arg7[%c0_37, %c80], %106 {strides = array<i32>} : memref<16x128xf32, #tpu.memory_space<vmem>>, vector<16x16xf32>,
    %108 = vector.extract_strided_slice %9 {offsets = [0, 96], sizes = [16, 16], strides = [1, 1]} : vector<16x128xf32> to vector<16x16xf32>
    %109 = vector.extract_strided_slice %10 {offsets = [0, 96], sizes = [16, 16], strides = [1, 1]} : vector<16x128xf32> to vector<16x16xf32>
    %110 = vector.extract_strided_slice %11 {offsets = [0, 96], sizes = [16, 16], strides = [1, 1]} : vector<16x128xf32> to vector<16x16xf32>
    %cst_38 = arith.constant dense<0.000000e+00> : vector<16x16xf32>
    %111 = tpu.matmul %108, %109, %cst_38 {dimension_numbers = #tpu.dot_dimension_numbers<[1], [1], [0], [0], [0, 0, 1, 0], [], []>} : vector<16x16xf32>, vector<16x16xf32>, vector<16x16xf32> -> vector<16x16xf32>
    %cst_39 = arith.constant dense<0xFF800000> : vector<16xf32>
    %112 = vector.multi_reduction <maximumf>, %111, %cst_39 [1] : vector<16x16xf32> to vector<16xf32>
    %113 = vector.shape_cast %112 : vector<16xf32> to vector<16x1xf32>
    %114 = vector.broadcast %113 : vector<16x1xf32> to vector<16x16xf32>
    %115 = arith.subf %111, %114 : vector<16x16xf32>
    %116 = math.exp %115 : vector<16x16xf32>
    %cst_40 = arith.constant dense<0.000000e+00> : vector<16xf32>
    %117 = vector.multi_reduction <add>, %116, %cst_40 [1] : vector<16x16xf32> to vector<16xf32>
    %118 = vector.shape_cast %117 : vector<16xf32> to vector<16x1xf32>
    %119 = tpu.reciprocal %118 : vector<16x1xf32> -> vector<16x1xf32>
    %cst_41 = arith.constant dense<0.000000e+00> : vector<16x16xf32>
    %120 = tpu.matmul %116, %110, %cst_41 {dimension_numbers = #tpu.dot_dimension_numbers<[1], [0], [0], [1], [0, 0, 1, 1], [], []>} : vector<16x16xf32>, vector<16x16xf32>, vector<16x16xf32> -> vector<16x16xf32>
    %121 = vector.broadcast %119 : vector<16x1xf32> to vector<16x16xf32>
    %122 = arith.mulf %120, %121 : vector<16x16xf32>
    %c0_42 = arith.constant 0 : index
    %c96 = arith.constant 96 : index
    %123 = vector.load %arg7[%c0_42, %c96] : memref<16x128xf32, #tpu.memory_space<vmem>>, vector<16x16xf32>
    tpu.vector_store %arg7[%c0_42, %c96], %122 {strides = array<i32>} : memref<16x128xf32, #tpu.memory_space<vmem>>, vector<16x16xf32>,
    %124 = vector.extract_strided_slice %9 {offsets = [0, 112], sizes = [16, 16], strides = [1, 1]} : vector<16x128xf32> to vector<16x16xf32>
    %125 = vector.extract_strided_slice %10 {offsets = [0, 112], sizes = [16, 16], strides = [1, 1]} : vector<16x128xf32> to vector<16x16xf32>
    %126 = vector.extract_strided_slice %11 {offsets = [0, 112], sizes = [16, 16], strides = [1, 1]} : vector<16x128xf32> to vector<16x16xf32>
    %cst_43 = arith.constant dense<0.000000e+00> : vector<16x16xf32>
    %127 = tpu.matmul %124, %125, %cst_43 {dimension_numbers = #tpu.dot_dimension_numbers<[1], [1], [0], [0], [0, 0, 1, 0], [], []>} : vector<16x16xf32>, vector<16x16xf32>, vector<16x16xf32> -> vector<16x16xf32>
    %cst_44 = arith.constant dense<0xFF800000> : vector<16xf32>
    %128 = vector.multi_reduction <maximumf>, %127, %cst_44 [1] : vector<16x16xf32> to vector<16xf32>
    %129 = vector.shape_cast %128 : vector<16xf32> to vector<16x1xf32>
    %130 = vector.broadcast %129 : vector<16x1xf32> to vector<16x16xf32>
    %131 = arith.subf %127, %130 : vector<16x16xf32>
    %132 = math.exp %131 : vector<16x16xf32>
    %cst_45 = arith.constant dense<0.000000e+00> : vector<16xf32>
    %133 = vector.multi_reduction <add>, %132, %cst_45 [1] : vector<16x16xf32> to vector<16xf32>
    %134 = vector.shape_cast %133 : vector<16xf32> to vector<16x1xf32>
    %135 = tpu.reciprocal %134 : vector<16x1xf32> -> vector<16x1xf32>
    %cst_46 = arith.constant dense<0.000000e+00> : vector<16x16xf32>
    %136 = tpu.matmul %132, %126, %cst_46 {dimension_numbers = #tpu.dot_dimension_numbers<[1], [0], [0], [1], [0, 0, 1, 1], [], []>} : vector<16x16xf32>, vector<16x16xf32>, vector<16x16xf32> -> vector<16x16xf32>
    %137 = vector.broadcast %135 : vector<16x1xf32> to vector<16x16xf32>
    %138 = arith.mulf %136, %137 : vector<16x16xf32>
    %c0_47 = arith.constant 0 : index
    %c112 = arith.constant 112 : index
    %139 = vector.load %arg7[%c0_47, %c112] : memref<16x128xf32, #tpu.memory_space<vmem>>, vector<16x16xf32>
    tpu.vector_store %arg7[%c0_47, %c112], %138 {strides = array<i32>} : memref<16x128xf32, #tpu.memory_space<vmem>>, vector<16x16xf32>,
    %c0_48 = arith.constant 0 : index
    %c0_49 = arith.constant 0 : index
    %140 = vector.load %arg7[%c0_48, %c0_49] : memref<16x128xf32, #tpu.memory_space<vmem>>, vector<16x128xf32>
    %c0_50 = arith.constant 0 : index
    %c0_51 = arith.constant 0 : index
    %141 = vector.load %arg4[%c0_50, %c0_51] : memref<128x128xf32, #tpu.memory_space<vmem>>, vector<128x128xf32>
    %cst_52 = arith.constant dense<0.000000e+00> : vector<16x128xf32>
    %142 = tpu.matmul %140, %141, %cst_52 {dimension_numbers = #tpu.dot_dimension_numbers<[1], [0], [0], [1], [0, 0, 1, 1], [], []>} : vector<16x128xf32>, vector<128x128xf32>, vector<16x128xf32> -> vector<16x128xf32>
    %c0_53 = arith.constant 0 : index
    %c0_54 = arith.constant 0 : index
    %143 = vector.load %arg5[%c0_53, %c0_54] : memref<1x128xf32, #tpu.memory_space<vmem>>, vector<1x128xf32>
    %144 = vector.broadcast %143 : vector<1x128xf32> to vector<16x128xf32>
    %145 = arith.addf %142, %144 : vector<16x128xf32>
    %c0_55 = arith.constant 0 : index
    %c0_56 = arith.constant 0 : index
    %c0_57 = arith.constant 0 : index
    %146 = vector.load %arg6[%c0_55, %c0_56, %c0_57] : memref<1x16x128xf32, #tpu.memory_space<vmem>>, vector<1x16x128xf32>
    %147 = vector.shape_cast %146 : vector<1x16x128xf32> to vector<16x128xf32>
    %148 = vector.shape_cast %145 : vector<16x128xf32> to vector<1x16x128xf32>
    tpu.vector_store %arg6[%c0_55, %c0_56, %c0_57], %148 {strides = array<i32>} : memref<1x16x128xf32, #tpu.memory_space<vmem>>, vector<1x16x128xf32>,
    return
  }
  func.func @transform_0(%arg0: i32) -> (i32, i32, i32) {
    %c0_i32 = arith.constant 0 : i32
    %c0_i32_0 = arith.constant 0 : i32
    %c0_i32_1 = arith.constant 0 : i32
    return %arg0, %c0_i32, %c0_i32_0 : i32, i32, i32
  }
  func.func @transform_1(%arg0: i32) -> (i32, i32) {
    %c0_i32 = arith.constant 0 : i32
    %c0_i32_0 = arith.constant 0 : i32
    %c0_i32_1 = arith.constant 0 : i32
    return %c0_i32, %c0_i32_0 : i32, i32
  }
  func.func @transform_2(%arg0: i32) -> (i32, i32) {
    %c0_i32 = arith.constant 0 : i32
    %c0_i32_0 = arith.constant 0 : i32
    %c0_i32_1 = arith.constant 0 : i32
    return %c0_i32, %c0_i32_0 : i32, i32
  }
  func.func @transform_3(%arg0: i32) -> (i32, i32) {
    %c0_i32 = arith.constant 0 : i32
    %c0_i32_0 = arith.constant 0 : i32
    %c0_i32_1 = arith.constant 0 : i32
    return %c0_i32, %c0_i32_0 : i32, i32
  }
  func.func @transform_4(%arg0: i32) -> (i32, i32) {
    %c0_i32 = arith.constant 0 : i32
    %c0_i32_0 = arith.constant 0 : i32
    %c0_i32_1 = arith.constant 0 : i32
    return %c0_i32, %c0_i32_0 : i32, i32
  }
  func.func @transform_5(%arg0: i32) -> (i32, i32, i32) {
    %c0_i32 = arith.constant 0 : i32
    %c0_i32_0 = arith.constant 0 : i32
    %c0_i32_1 = arith.constant 0 : i32
    return %arg0, %c0_i32, %c0_i32_0 : i32, i32, i32
  }
}

</mosaic_0001>

<bundles_post_ra>
// kernel: attentione_forward.1
= control target key start
LH: loop header
LB: loop body
LE: loop exit
PB: predicated region body
PF: predicated region fallthrough
CT: control target
= control target key end

     0   :  { %10 = vsyncpa [#allocation4], 0  ;;  %s3605_s0 = inlined_call_operand.hbm [shape: f32[2,16,128], index: 0, kind: input, shape index: {}]   ;;  %s3606_s1 = inlined_call_operand.hbm [shape: f32[128,384], index: 1, kind: input, shape index: {}]   ;;  %s3607_s2 = inlined_call_operand.vmem [shape: f32[1,384], index: 2, kind: input, shape index: {}]   ;;  %s3608_s3 = inlined_call_operand.hbm [shape: f32[128,128], index: 3, kind: input, shape index: {}]   ;;  %s3609_s4 = inlined_call_operand.vmem [shape: f32[1,128], index: 4, kind: input, shape index: {}]   ;;  %s3610_s5 = inlined_call_operand.hbm [shape: f32[2,16,128], index: 5, kind: output, shape index: {}]  }
   0x1   :  { %12 = vsyncpa [#allocation4 + $0x1], 0 }
   0x2   :  { %13 = vsyncpa [#allocation7], 0 }
   0x3   :  { %14 = vsyncpa [#allocation5], 0 }
   0x4   :  { %16 = vsyncpa [#allocation5 + $0x1], 0  ;;  %s3067_s18 = smov 0   ;;  %s3069_s19 = smov 0  }
   0x5   :  { %s3071_s20 = smov 0   ;;  %s3073_s21 = smov 0  }
   0x6 LB: > { %s3088_s22 = sadd.s32 4294967295, %s3017_s21   ;;  %s2373_s23 = sadd.s32 4294967294, %s3017_s21   ;;  %s3017_s21 = sphi %s3073_s21, %s3634_s21   ;;  %s3013_s20 = sphi %s3071_s20, %s3633_s20   ;;  %s3009_s19 = sphi %s3069_s19, %s3632_s19   ;;  %s3005_s18 = sphi %s3067_s18, %s3631_s18  }
   0x7   : > { %p42_p0 = scmp.ne.s32.totalorder %s3009_s19, %s3005_s18  ;;  %p3611_p1 = scmp.eq.s32.totalorder %s3088_s22, 0 }
   0x8   : > { %p156_p3 = scmp.eq.s32.totalorder %s2373_s23, 1  ;;  %p2374_p5 = scmp.ge.s32.totalorder %s3017_s21, 1 }
   0x9   : > { %p3097_p4 = por %p3611_p1, %p42_p0  ;;  %p163_p7 = scmp.lt.s32.totalorder %s3017_s21, 3 }
   0xa   : > { %p3102_p6 = por %p156_p3, %p42_p0  ;;  %s3019_s27 = smov [#allocation6]  }
   0xb   : > { %s3616_s24 = scalar_select %p3097_p4, 1, 0 }
   0xc   : > { %s3617_s25 = scalar_select %p3102_p6, 1, 0 }
   0xd   : > { %p3107_p8 = pnand %p2374_p5, %p163_p7  ;;  %s175_s28 = sshll.u32 %s3019_s27, 4  ;;  %s176_s28 = int_to_ptr.vmem [resolvable:$true] %s175_s28 }
   0xe   : > { %s3020_s30 = smov [#allocation8]   ;;  %s2880_s7 = scalar_lea.vmem %s176_s28, 6144 }
   0xf   : > { %s3618_s26 = scalar_select %p3107_p8, 1, 0 }
  0x10   : > { %p2736_p9 = pneg %p3107_p8  ;;  %s191_s6 = sshll.u32 %s3020_s30, 4  ;;  %s192_s6 = int_to_ptr.vmem [resolvable:$true] %s191_s6 }
  0x11   : > { %p2881_p13 = scmp.ne.s32.totalorder %s176_s28, %s2880_s7  ;;  %p2888_p5 = scmp.lt.s32.totalorder %s176_s28, %s176_s28 }
  0x12   : > { %p3116_p11 = pnand %p2736_p9, %p3611_p1  ;;  %p2889_p7 = scmp.lt.s32.totalorder %s2880_s7, %s2880_s7 }
  0x14   : > { %p2871_p12 = pneg %p3116_p11  ;;  %p2890_p10 = por %p2889_p7, %p2888_p5 }
  0x16   : > { %p2883_p0 = pnand %p2881_p13, %p2871_p12 }
  0x18   : > { %p2884_p3 = pneg %p2883_p0 }
  0x1a   : > { %p2891_p9 = pnand %p2890_p10, %p2884_p3 }
  0x1c   : > { %2894 = shalt.err (!%p2891_p9)
}
  0x1d   : > { %s3021_s8 = smov 384   ;;  %s3022_s9 = smov 24  }
  0x1e   : > { %2739 = dma.hbm_to_vmem [thread:$0]  (!%p3116_p11), %s3606_s1, 6144, %s176_s28, [#allocation7], %s3021_s8, %s3021_s8, %s3022_s9  }
  0x1f   : > { %s2906_s12 = scalar_lea.vmem %s192_s6, 2048  ;;  %p2914_p2 = scmp.lt.s32.totalorder %s192_s6, %s192_s6 }
  0x20   : > { %p2907_p1 = scmp.ne.s32.totalorder %s192_s6, %s2906_s12  ;;  %p2915_p6 = scmp.lt.s32.totalorder %s2906_s12, %s2906_s12 }
  0x22   : > { %p2909_p13 = pnand %p2907_p1, %p2871_p12  ;;  %p2916_p5 = por %p2915_p6, %p2914_p2 }
  0x24   : > { %p2910_p0 = pneg %p2909_p13 }
  0x26   : > { %p2917_p10 = pnand %p2916_p5, %p2910_p0 }
  0x28   : > { %2920 = shalt.err (!%p2917_p10)
}
  0x29   : > { %s3612_s13 = smov 128   ;;  %s3024_s14 = smov 8  }
  0x2a   : > { %2742 = dma.hbm_to_vmem [thread:$0]  (!%p3116_p11), %s3608_s3, 2048, %s192_s6, [#allocation7], %s3612_s13, %s3612_s13, %s3024_s14  }
  0x2b   : > { %s3142_s17 = sadd.s32 1, %s3017_s21   ;;  %s29_s27 = sadd.s32 1, %s3013_s20 }
  0x2c   : > { %s26_s23 = ssub.s32 %s3017_s21, %s3142_s17  ;;  %p36_p2 = scmp.ne.s32.totalorder %s3013_s20, %s3009_s19 }
  0x2d   : > { %p27_p1 = scmp.eq.s32.totalorder %s26_s23, 0  ;;  %p37_p6 = scmp.eq.s32.totalorder %s3017_s21, 0 }
  0x2e   : > { %p3620_p3 = scmp.eq.s32.totalorder %s3088_s22, 1  ;;  %p2753_p9 = scmp.lt.s32.totalorder %s3017_s21, 2 }
  0x2f   : > { %s3151_s28 = scalar_select %p27_p1, %s3013_s20, %s29_s27  }
  0x30   : > { %p38_p12 = por %p37_p6, %p36_p2  ;;  %p3155_p7 = por %p3620_p3, %p36_p2 }
  0x31   : > { %s208_s30 = sand.u32 1, %s3013_s20   ;;  %s2440_s6 = sshll.u32 %s3017_s21, 8 }
  0x32   : > { %s3621_s29 = scalar_select %p3155_p7, 1, 0 }
  0x33   : > { %s2378_s7 = sshll.u32 %s208_s30, 4  ;;  %s3165_s10 = scalar_lea.hbm %s3605_s0, %s2440_s6 }
  0x34   : > { %s212_s11 = scalar_lea.vmem [#allocation3], %s2378_s7  ;;  %p3169_p11 = pnand %p2753_p9, %p38_p12 }
  0x35   : > { %s219_s12 = sshll.u32 %s212_s11, 4  ;;  %s3173_s16 = scalar_lea.sflag [#allocation4], %s208_s30  ;;  %s3167_s12 = int_to_ptr.vmem [resolvable:$true] %s219_s12 }
  0x36   : > { %s2921_s23 = scalar_lea.hbm %s3165_s10, 256  ;;  %p2923_p0 = pneg %p3169_p11 }
  0x37   : > { %p2922_p13 = scmp.ne.s32.totalorder %s3165_s10, %s2921_s23  ;;  %s2926_s7 = scalar_lea.hbm %s3605_s0, 512 }
  0x38   : > { %p2927_p1 = scmp.lt.s32.totalorder %s3165_s10, %s3605_s0  ;;  %p2928_p2 = scmp.lt.s32.totalorder %s2926_s7, %s2921_s23 }
  0x39   : > { %p2924_p5 = pnand %p2923_p0, %p2922_p13 }
  0x3a   : > { %p2929_p6 = por %p2928_p2, %p2927_p1 }
  0x3b   : > { %p2925_p10 = pneg %p2924_p5 }
  0x3d   : > { %p2930_p12 = pnand %p2929_p6, %p2925_p10 }
  0x3f   : > { %2933 = shalt.err (!%p2930_p12)
}
  0x40   : > { %s2934_s30 = scalar_lea.vmem %s3167_s12, 256  ;;  %s3025_s11 = smov [#allocation3]  }
  0x41   : > { %p2935_p3 = scmp.ne.s32.totalorder %s3167_s12, %s2934_s30  ;;  %s2939_s13 = sshll.u32 %s3025_s11, 4  ;;  %s2940_s13 = int_to_ptr.vmem [resolvable:$false] %s2939_s13 }
  0x42   : > { %s2941_s27 = scalar_lea.vmem %s2940_s13, 512  ;;  %p2942_p5 = scmp.lt.s32.totalorder %s3167_s12, %s2940_s13 }
  0x43   : > { %p2937_p9 = pnand %p2935_p3, %p2923_p0  ;;  %p2943_p7 = scmp.lt.s32.totalorder %s2941_s27, %s2934_s30 }
  0x45   : > { %p2938_p13 = pneg %p2937_p9  ;;  %p2944_p4 = por %p2943_p7, %p2942_p5 }
  0x47   : > { %p2945_p8 = pnand %p2944_p4, %p2938_p13 }
  0x49   : > { %2948 = shalt.err (!%p2945_p8)
}
  0x4a   : > { %s3623_s23 = smov 128   ;;  %p3624_p0 = scmp.ne.s32.totalorder %s3618_s26, 0 }
  0x4b   : > { %2746 = dma.hbm_to_vmem [thread:$0]  (!%p3169_p11), %s3165_s10, 256, %s3167_s12, %s3173_s16, %s3623_s23, %s3623_s23, %s3024_s14  }
  0x4c   : > { %231 = sbr.rel (%p3624_p0) target bundleno = 3036 (0xbdc), region = 40  ;;  %s3200_s6 = sand.u32 (!%p3624_p0), 1, %s3009_s19  }
  0x4d   : > { %s2382_s13 = sshll.u32 (!%p3624_p0), %s3200_s6, 4  ;;  %s234_s7 = scalar_lea.sflag (!%p3624_p0), [#allocation4], %s3200_s6 }
  0x4e   : > { %s3206_s15 = scalar_lea.vmem (!%p3624_p0), [#allocation3], %s2382_s13  ;;  %p3625_p4 = scmp.ne.s32.totalorder (!%p3624_p0), %s3616_s24, 0 }
  0x51   : > { %2992 = dma.done.wait (%p3625_p4), %s234_s7, 256  }
  0x52   : > { %2994 = vsyncadd (%p3625_p4), %s234_s7, 4294967040  ;;  %p3626_p8 = scmp.eq.s32.totalorder %s3088_s22, 0 }
  0x54   : > { %2996 = dma.done.wait (%p3626_p8), [#allocation7], 8192   ;;  %p3627_p7 = pmov %p3626_p8 }
  0x55   : > { %v3026_v0 = vmov 0.0   ;;  %v320_v1 = vld [vmem:[#allocation6 + $0x170] sm:$0xff]  ;;  %v319_v2 = vld [vmem:[#allocation6 + $0x168] sm:$0xff]  ;;  %v317_v3 = vld [vmem:[#allocation6 + $0x158] sm:$0xff]  ;;  %v324_v51 = vlaneseq  ;;  %vm493_vm0 = vcmask 130048   ;;  %s3027_s14 = smov 112  }
  0x56   : > { %2998 = vsyncadd (%p3627_p7), [#allocation7], 4294959104  ;;  %403 = vmatprep.mubr.f32.mxu0 %v3026_v0  ;;  %339 = vmatprep.subr.mxu0 %v320_v1  ;;  %v316_v4 = vld [vmem:[#allocation6 + $0x150] sm:$0xff]  ;;  %v314_v5 = vld [vmem:[#allocation6 + $0x140] sm:$0xff]  ;;  %s3028_s10 = smov 96   ;;  %s3029_s12 = smov 80  }
  0x57   : > { %340 = vmatpush1.msra.mxu0 %v319_v2  ;;  %v313_v6 = vld [vmem:[#allocation6 + $0x138] sm:$0xff]  ;;  %v311_v7 = vld [vmem:[#allocation6 + $0x128] sm:$0xff]  ;;  %v310_v8 = vld [vmem:[#allocation6 + $0x120] sm:$0xff]  ;;  %v325_v52 = vshrl.u32 %v324_v51, 7  ;;  %s3030_s16 = smov 64   ;;  %s3031_s8 = smov 48  }
  0x58   : > { %341 = vmatprep.subr.mxu0 %v317_v3  ;;  %v308_v9 = vld [vmem:[#allocation6 + $0x110] sm:$0xff]  ;;  %v307_v10 = vld [vmem:[#allocation6 + $0x108] sm:$0xff]  ;;  %v305_v11 = vld [vmem:[#allocation6 + $0xf8] sm:$0xff]  ;;  %s3032_s9 = smov 32   ;;  %s3033_s30 = smov 16   ;;  %vm896_vm1 = vcmask 261248  }
  0x59   : > { %342 = vmatpush1.msra.mxu0 %v316_v4  ;;  %v304_v12 = vld [vmem:[#allocation6 + $0xf0] sm:$0xff]  ;;  %v302_v13 = vld [vmem:[#allocation6 + $0xe0] sm:$0xff]  ;;  %v301_v15 = vld [vmem:[#allocation6 + $0xd8] sm:$0xff]  ;;  %v326_v53 = vsub.s32 0, %v325_v52  ;;  %v330_v58 = vsub.s32 1, %v325_v52  ;;  %vm1107_vm2 = vcmask 392448  }
  0x5a   : > { %343 = vmatprep.subr.mxu0 %v314_v5  ;;  %v3218_v14 = vld [vmem:[%s3206_s15] sm:$0xff]  ;;  %v321_v16 = vld [vmem:[#allocation6 + $0x178] sm:$0xff]  ;;  %v299_v18 = vld [vmem:[#allocation6 + $0xc8] sm:$0xff]  ;;  %vm1318_vm3 = vcmask 523648   ;;  %vm1529_vm4 = vcmask 654848   ;;  %vm1740_vm5 = vcmask 786048  }
  0x5b   : > { %344 = vmatpush1.msra.mxu0 %v313_v6  ;;  %v318_v17 = vld [vmem:[#allocation6 + $0x160] sm:$0xff]  ;;  %2574 = vmatprep.mubr.f32.mxu1 %v3218_v14  ;;  %v315_v20 = vld [vmem:[#allocation6 + $0x148] sm:$0xff]  ;;  %v296_v21 = vld [vmem:[#allocation6 + $0xb0] sm:$0xff]  ;;  %vm1951_vm6 = vcmask 917248   ;;  %vm2162_vm7 = vcmask 1048448   ;;  %s271_s23 = scalar_lea.vmem [#allocation9], %s2382_s13 }
  0x5c   : > { %345 = vmatprep.subr.mxu0 %v311_v7  ;;  %2542 = vmatprep.subr.mxu1 %v321_v16  ;;  %v298_v19 = vld [vmem:[#allocation6 + $0xc0] sm:$0xff]  ;;  %v295_v22 = vld [vmem:[#allocation6 + $0xa8] sm:$0xff]  ;;  %v312_v23 = vld [vmem:[#allocation6 + $0x130] sm:$0xff]  ;;  %s2281_s7 = sshll.u32 %s271_s23, 4  ;;  %p3628_p10 = scmp.ne.s32.totalorder %s3621_s29, 0  ;;  %s3557_s7 = int_to_ptr.vmem [resolvable:$true] %s2281_s7 }
  0x5d   : > { %346 = vmatpush1.msra.mxu0 %v310_v8  ;;  %2543 = vmatpush3.msra.mxu1 %v321_v16  ;;  %v293_v24 = vld [vmem:[#allocation6 + $0x98] sm:$0xff]  ;;  %v292_v25 = vld [vmem:[#allocation6 + $0x90] sm:$0xff]  ;;  %v290_v27 = vld [vmem:[#allocation6 + $0x80] sm:$0xff]  ;;  %s2949_s13 = scalar_lea.vmem %s3557_s7, 256 }
  0x5e   : > { %347 = vmatprep.subr.mxu0 %v308_v9  ;;  %2544 = vmatprep.subr.mxu1 %v318_v17  ;;  %v309_v26 = vld [vmem:[#allocation6 + $0x118] sm:$0xff]  ;;  %v306_v29 = vld [vmem:[#allocation6 + $0x100] sm:$0xff]  ;;  %v287_v30 = vld [vmem:[#allocation6 + $0x68] sm:$0xff]  ;;  %p2950_p11 = scmp.ne.s32.totalorder %s3557_s7, %s2949_s13 }
  0x5f   : > { %348 = vmatpush1.msra.mxu0 %v307_v10  ;;  %2545 = vmatpush3.msra.mxu1 %v318_v17  ;;  %v289_v28 = vld [vmem:[#allocation6 + $0x78] sm:$0xff]  ;;  %v286_v31 = vld [vmem:[#allocation6 + $0x60] sm:$0xff]  ;;  %v303_v32 = vld [vmem:[#allocation6 + $0xe8] sm:$0xff] }
  0x60   : > { %349 = vmatprep.subr.mxu0 %v305_v11  ;;  %2546 = vmatprep.subr.mxu1 %v315_v20  ;;  %v284_v33 = vld [vmem:[#allocation6 + $0x50] sm:$0xff]  ;;  %v283_v34 = vld [vmem:[#allocation6 + $0x48] sm:$0xff]  ;;  %v281_v36 = vld [vmem:[#allocation6 + $0x38] sm:$0xff]  ;;  %p2951_p1 = pnand %p2950_p11, %p3628_p10 }
  0x61   : > { %350 = vmatpush1.msra.mxu0 %v304_v12  ;;  %2547 = vmatpush3.msra.mxu1 %v315_v20  ;;  %v300_v35 = vld [vmem:[#allocation6 + $0xd0] sm:$0xff]  ;;  %v297_v38 = vld [vmem:[#allocation6 + $0xb8] sm:$0xff]  ;;  %v278_v39 = vld [vmem:[#allocation6 + $0x20] sm:$0xff] }
  0x62   : > { %351 = vmatprep.subr.mxu0 %v302_v13  ;;  %2548 = vmatprep.subr.mxu1 %v312_v23  ;;  %v280_v37 = vld [vmem:[#allocation6 + $0x30] sm:$0xff]  ;;  %v277_v40 = vld [vmem:[#allocation6 + $0x18] sm:$0xff]  ;;  %v294_v41 = vld [vmem:[#allocation6 + $0xa0] sm:$0xff]  ;;  %p2952_p2 = pneg %p2951_p1 }
  0x63   : > { %352 = vmatpush1.msra.mxu0 %v301_v15  ;;  %2549 = vmatpush3.msra.mxu1 %v312_v23  ;;  %v275_v42 = vld [vmem:[#allocation6 + $0x8] sm:$0xff]  ;;  %v274_v43 = vld [vmem:[#allocation6] sm:$0xff]  ;;  %v288_v45 = vld [vmem:[#allocation6 + $0x70] sm:$0xff] }
  0x64   : > { %353 = vmatprep.subr.mxu0 %v299_v18  ;;  %2550 = vmatprep.subr.mxu1 %v309_v26  ;;  %v291_v44 = vld [vmem:[#allocation6 + $0x88] sm:$0xff]  ;;  %v285_v46 = vld [vmem:[#allocation6 + $0x58] sm:$0xff]  ;;  %v282_v48 = vld [vmem:[#allocation6 + $0x40] sm:$0xff] }
  0x65   : > { %354 = vmatpush1.msra.mxu0 %v298_v19  ;;  %2551 = vmatpush3.msra.mxu1 %v309_v26  ;;  %v273_v47 = vld [vmem:[%s3206_s15 + $0x8] sm:$0xff]  ;;  %v276_v50 = vld [vmem:[#allocation6 + $0x10] sm:$0xff]  ;;  %s2441_s15 = sshll.u32 %s3088_s22, 8  ;;  %s3034_s22 = smov [#allocation9]  }
  0x66   : > { %355 = vmatprep.subr.mxu0 %v296_v21  ;;  %2552 = vmatprep.subr.mxu1 %v306_v29  ;;  %v279_v49 = vld [vmem:[#allocation6 + $0x28] sm:$0xff]  ;;  %v322_v54 = vld [vmem:[%s3607_s2] sm:$0x7] }
  0x67   : > { %356 = vmatpush1.msra.mxu0 %v295_v22  ;;  %2553 = vmatpush3.msra.mxu1 %v306_v29  ;;  %v327_v55 = vrot.slane %v322_v54, %v326_v53  ;;  %v331_v62 = vrot.slane %v322_v54, %v330_v58 }
  0x68   : > { %357 = vmatprep.subr.mxu0 %v293_v24  ;;  %2554 = vmatprep.subr.mxu1 %v303_v32 }
  0x69   : > { %358 = vmatpush1.msra.mxu0 %v292_v25  ;;  %2555 = vmatpush3.msra.mxu1 %v303_v32 }
  0x6a   : > { %359 = vmatprep.subr.mxu0 %v290_v27  ;;  %2556 = vmatprep.subr.mxu1 %v300_v35 }
  0x6b   : > { %360 = vmatpush1.msra.mxu0 %v289_v28  ;;  %2557 = vmatpush3.msra.mxu1 %v300_v35 }
  0x6c   : > { %361 = vmatprep.subr.mxu0 %v287_v30  ;;  %2558 = vmatprep.subr.mxu1 %v297_v38 }
  0x6d   : > { %362 = vmatpush1.msra.mxu0 %v286_v31  ;;  %2559 = vmatpush3.msra.mxu1 %v297_v38 }
  0x6e   : > { %363 = vmatprep.subr.mxu0 %v284_v33  ;;  %2560 = vmatprep.subr.mxu1 %v294_v41 }
  0x6f   : > { %364 = vmatpush1.msra.mxu0 %v283_v34  ;;  %2561 = vmatpush3.msra.mxu1 %v294_v41 }
  0x70   : > { %365 = vmatprep.subr.mxu0 %v281_v36  ;;  %2562 = vmatprep.subr.mxu1 %v291_v44 }
  0x71   : > { %366 = vmatpush1.msra.mxu0 %v280_v37  ;;  %2563 = vmatpush3.msra.mxu1 %v291_v44 }
  0x72   : > { %367 = vmatprep.subr.mxu0 %v278_v39  ;;  %2564 = vmatprep.subr.mxu1 %v288_v45 }
  0x73   : > { %368 = vmatpush1.msra.mxu0 %v277_v40  ;;  %2565 = vmatpush3.msra.mxu1 %v288_v45 }
  0x74   : > { %369 = vmatprep.subr.mxu0 %v275_v42  ;;  %2566 = vmatprep.subr.mxu1 %v285_v46 }
  0x75   : > { %370 = vmatpush1.msra.mxu0 %v274_v43  ;;  %2567 = vmatpush3.msra.mxu1 %v285_v46 }
  0x76   : > { %404 = vmatmul.mubr.f32.vlgmr.msra.gmra.mxu0 %v3218_v14  ;;  %2568 = vmatprep.subr.mxu1 %v282_v48 }
  0x77   : > { %409 = vmatprep.mubr.f32.mxu0 %v3026_v0  ;;  %2569 = vmatpush3.msra.mxu1 %v282_v48  ;;  %v334_v0 = vsub.s32 2, %v325_v52 }
  0x78   : > { %2570 = vmatprep.subr.mxu1 %v279_v49 }
  0x79   : > { %2571 = vmatpush3.msra.mxu1 %v279_v49  ;;  %v335_v3 = vrot.slane %v322_v54, %v334_v0 }
  0x7a   : > { %410 = vmatmul.mubr.f32.gmra.mxu0 %v273_v47  ;;  %2572 = vmatprep.subr.mxu1 %v276_v50 }
  0x7b   : > { %2573 = vmatpush3.msra.mxu1 %v276_v50 }
  0x7c   : > { %2575 = vmatmul.mubr.f32.vlgmr.msra.gmra.mxu1 %v273_v47 }
 0x136   : > { %v405_v56 = vpop.f32.mrf.mxu0 }
 0x137   : > { %v406_v57 = vadd.f32 %v405_v56, %v327_v55 }
 0x138   : > { %v407_v59 = vpop.f32.mrf.mxu0 }
 0x139   : > { %v3227_v60 = vmul.f32 4.0, %v406_v57  ;;  %v3233_v2 = vadd.f32 %v407_v59, %v331_v62 }
 0x13a   : > { %v411_v61 = vpop.f32.mrf.mxu0 }
 0x13b   : > { %2581 = vmatprep.mubr.msk.f32.mxu0 %vm493_vm0, %v3227_v60  ;;  %v412_v4 = vadd.f32 %v411_v61, %v327_v55 }
 0x13c   : > { %v413_v63 = vpop.f32.mrf.mxu0  ;;  %v2576_v5 = vpop.f32.mrf.mxu1 }
 0x13d   : > { %v3231_v1 = vadd.f32 %v413_v63, %v331_v62  ;;  %v3243_v6 = vadd.f32 %v2576_v5, %v335_v3  ;;  %v3252_v9 = vmul.f32 4.0, %v412_v4 }
 0x13e   : > { %v482_v7 = vpop.f32.mrf.mxu1 }
 0x13f   : > { %692 = vrot.lane.b32.xlu1 %v3231_v1, %s3027_s14  ;;  %2577 = vmatprep.subr.msk.mxu0 %vm493_vm0, %v3231_v1  ;;  %v3249_v8 = vadd.f32 %v482_v7, %v335_v3 }
 0x140   : > { %2578 = vmatpush3.xpose.msk.msra.mxu0 %vm493_vm0, %v3231_v1  ;;  %2584 = vmatprep.subr.mxu1 %v3243_v6 }
 0x141   : > { %2579 = vmatprep.subr.msk.mxu0 %vm493_vm0, %v3233_v2  ;;  %2585 = vmatpush3.msra.mxu1 %v3243_v6 }
 0x142   : > { %2586 = vmatprep.subr.mxu1 %v3249_v8 }
 0x143   : > { %690 = vrot.lane.b32.xlu1 %v3233_v2, %s3027_s14  ;;  %2587 = vmatpush3.msra.mxu1 %v3249_v8 }
 0x144   : > { %2580 = vmatpush3.xpose.msk.msra.mxu0 %vm493_vm0, %v3233_v2 }
 0x147   : > { %905 = vrot.lane.b32.xlu1 %v3231_v1, %s3028_s10  ;;  %2582 = vmatmul.mubr.msk.f32.vlgmr.msra.gmra.mxu0 %vm493_vm0, %v3252_v9 }
 0x14b   : > { %688 = vrot.lane.b32.xlu1 %v3252_v9, %s3027_s14 }
 0x14f   : > { %903 = vrot.lane.b32.xlu1 %v3233_v2, %s3028_s10 }
 0x153   : > { %899 = vrot.lane.b32.xlu1 %v3227_v60, %s3028_s10 }
 0x157   : > { %901 = vrot.lane.b32.xlu1 %v3252_v9, %s3028_s10 }
 0x15b   : > { %1010 = vrot.lane.b32.xlu1 %v3249_v8, %s3028_s10 }
 0x15f   : > { %1116 = vrot.lane.b32.xlu1 %v3231_v1, %s3029_s12 }
 0x1b1   : > { %v693_v10 = vpop.permute.xlu1 %692 }
 0x1b2   : > { %2591 = vmatprep.subr.msk.mxu1 %vm493_vm0, %v693_v10 }
 0x1b5   : > { %v691_v20 = vpop.permute.xlu1 %690 }
 0x1b9   : > { %v906_v22 = vpop.permute.xlu1 %905 }
 0x1bd   : > { %v689_v24 = vpop.permute.xlu1 %688 }
 0x1c1   : > { %v904_v27 = vpop.permute.xlu1 %903 }
 0x1c5   : > { %v900_v28 = vpop.permute.xlu1 %899 }
 0x1c9   : > { %v902_v29 = vpop.permute.xlu1 %901 }
 0x1cd   : > { %v1011_v38 = vpop.permute.xlu1 %1010 }
 0x1d1   : > { %v1117_v39 = vpop.permute.xlu1 %1116 }
 0x207   : > { %v2583_v11 = vpop.f32.mrf.mxu0 }
 0x208   : > { %v584_v14 = vsel %vm493_vm0, %v2583_v11, -inf }
 0x209   : > { %v572_v12 = vpop.f32.mrf.mxu0 }
 0x20a   : > { %v581_v13 = vsel %vm493_vm0, %v572_v12, -inf }
 0x20b   : > { %582 = vmax.xlane.f32.xlu0 %v581_v13 }
 0x20f   : > { %585 = vmax.xlane.f32.xlu0 %v584_v14 }
 0x225   : > { %686 = vrot.lane.b32.xlu0 %v3227_v60, %s3027_s14 }
 0x294   : > { %v583_v15 = vpop.xlane.xlu0 %582 }
 0x295   : > { %v587_v16 = vsub.f32 %v572_v12, %v583_v15 }
 0x297   : > { %v589_v17 = vmul.f32 1.442695, %v587_v16 }
 0x298   : > { %v586_v18 = vpop.xlane.xlu0 %585 }
 0x299   : > { %2805 = vpow2.f32 %v589_v17  ;;  %v588_v19 = vsub.f32 %v2583_v11, %v586_v18 }
 0x29b   : > { %v591_v21 = vmul.f32 1.442695, %v588_v19 }
 0x29c   : > { %v687_v26 = vpop.permute.xlu0 %686 }
 0x29d   : > { %2807 = vpow2.f32 %v591_v21 }
 0x2a6   : > { %v3278_v23 = vpop.eup %2805 }
 0x2a7   : > { %2588 = vmatprep.mubr.msk.f32.mxu1 %vm493_vm0, %v3278_v23 }
 0x2aa   : > { %v3282_v25 = vpop.eup %2807 }
 0x2ab   : > { %2589 = vmatmul.mubr.msk.f32.vlgmr.msra.gmra.mxu1 %vm493_vm0, %v3282_v25 }
 0x2ac   : > { %2592 = vmatpush3.xpose.msk.msra.mxu1 %vm493_vm0, %v693_v10  ;;  %2595 = vmatprep.mubr.msk.f32.mxu1 %vm493_vm0, %v687_v26 }
 0x2ad   : > { %2593 = vmatprep.subr.msk.mxu1 %vm493_vm0, %v691_v20 }
 0x2b0   : > { %2594 = vmatpush3.xpose.msk.msra.mxu1 %vm493_vm0, %v691_v20 }
 0x2b1   : > { %2605 = vmatprep.subr.msk.mxu1 %vm493_vm0, %v906_v22 }
 0x2b3   : > { %2596 = vmatmul.mubr.msk.f32.vlgmr.msra.gmra.mxu1 %vm493_vm0, %v689_v24 }
 0x2b4   : > { %2606 = vmatpush3.xpose.msk.msra.mxu1 %vm493_vm0, %v906_v22  ;;  %2609 = vmatprep.mubr.msk.f32.mxu1 %vm493_vm0, %v900_v28 }
 0x2b5   : > { %2607 = vmatprep.subr.msk.mxu1 %vm493_vm0, %v904_v27 }
 0x2b8   : > { %2608 = vmatpush3.xpose.msk.msra.mxu1 %vm493_vm0, %v904_v27 }
 0x2bb   : > { %2610 = vmatmul.mubr.msk.f32.vlgmr.msra.gmra.mxu1 %vm493_vm0, %v902_v29 }
 0x36b   : > { %v3297_v30 = vpop.f32.mrf.mxu1 }
 0x36d   : > { %v3299_v31 = vpop.f32.mrf.mxu1 }
 0x373   : > { %v3301_v32 = vpop.f32.mrf.mxu1 }
 0x374   : > { %v780_v4 = vsel %vm493_vm0, %v3301_v32, -inf }
 0x375   : > { %v3303_v33 = vpop.f32.mrf.mxu1 }
 0x376   : > { %v777_v3 = vsel %vm493_vm0, %v3303_v33, -inf }
 0x37b   : > { %v2611_v34 = vpop.f32.mrf.mxu1 }
 0x37c   : > { %v993_v35 = vsel %vm493_vm0, %v2611_v34, -inf }
 0x37d   : > { %994 = vmax.xlane.f32.xlu0 %v993_v35  ;;  %v981_v36 = vpop.f32.mrf.mxu1 }
 0x37e   : > { %v990_v37 = vsel %vm493_vm0, %v981_v36, -inf }
 0x37f   : > { %991 = vmax.xlane.f32.xlu1 %v990_v37 }
 0x390   : > { %1110 = vrot.lane.b32.xlu1 %v3227_v60, %s3029_s12 }
 0x393   : > { %1012 = vrot.lane.b32.xlu0 %v3243_v6, %s3028_s10 }
 0x394   : > { %1112 = vrot.lane.b32.xlu1 %v3252_v9, %s3029_s12 }
 0x397   : > { %1114 = vrot.lane.b32.xlu0 %v3233_v2, %s3029_s12 }
 0x398   : > { %1321 = vrot.lane.b32.xlu1 %v3227_v60, %s3030_s16 }
 0x39b   : > { %1327 = vrot.lane.b32.xlu0 %v3231_v1, %s3030_s16 }
 0x39c   : > { %1432 = vrot.lane.b32.xlu1 %v3249_v8, %s3030_s16 }
 0x39f   : > { %1325 = vrot.lane.b32.xlu0 %v3233_v2, %s3030_s16 }
 0x3a3   : > { %1323 = vrot.lane.b32.xlu0 %v3252_v9, %s3030_s16 }
 0x406   : > { %v995_v40 = vpop.xlane.xlu0 %994 }
 0x407   : > { %v997_v41 = vsub.f32 %v2611_v34, %v995_v40 }
 0x408   : > { %v992_v42 = vpop.xlane.xlu1 %991 }
 0x409   : > { %v996_v43 = vsub.f32 %v981_v36, %v992_v42  ;;  %v1000_v44 = vmul.f32 1.442695, %v997_v41 }
 0x40a   : > { %v1013_v45 = vpop.permute.xlu0 %1012 }
 0x40b   : > { %v998_v46 = vmul.f32 1.442695, %v996_v43  ;;  %2612 = vmatprep.subr.mxu1 %v1013_v45 }
 0x40c   : > { %2613 = vmatpush3.msra.mxu1 %v1013_v45  ;;  %v1111_v47 = vpop.permute.xlu1 %1110 }
 0x40d   : > { %2809 = vpow2.f32 %v998_v46  ;;  %2614 = vmatprep.subr.mxu1 %v1011_v38 }
 0x40e   : > { %2811 = vpow2.f32 %v1000_v44  ;;  %2615 = vmatpush3.msra.mxu1 %v1011_v38  ;;  %v1115_v48 = vpop.permute.xlu0 %1114 }
 0x40f   : > { %2619 = vmatprep.subr.msk.mxu1 %vm493_vm0, %v1117_v39 }
 0x410   : > { %v1113_v51 = vpop.permute.xlu1 %1112 }
 0x412   : > { %v1328_v52 = vpop.permute.xlu0 %1327 }
 0x414   : > { %v1322_v53 = vpop.permute.xlu1 %1321 }
 0x416   : > { %v1326_v54 = vpop.permute.xlu0 %1325 }
 0x418   : > { %v1433_v10 = vpop.permute.xlu1 %1432 }
 0x41a   : > { %v3326_v49 = vpop.eup %2809  ;;  %v1324_v55 = vpop.permute.xlu0 %1323 }
 0x41b   : > { %v3328_v50 = vpop.eup %2811  ;;  %2616 = vmatprep.mubr.msk.f32.mxu1 %vm493_vm0, %v3326_v49 }
 0x41c   : > { %2617 = vmatmul.mubr.msk.f32.vlgmr.msra.gmra.mxu1 %vm493_vm0, %v3328_v50 }
 0x41d   : > { %2620 = vmatpush3.xpose.msk.msra.mxu1 %vm493_vm0, %v1117_v39  ;;  %2623 = vmatprep.mubr.msk.f32.mxu1 %vm493_vm0, %v1111_v47 }
 0x41e   : > { %2621 = vmatprep.subr.msk.mxu1 %vm493_vm0, %v1115_v48 }
 0x421   : > { %2622 = vmatpush3.xpose.msk.msra.mxu1 %vm493_vm0, %v1115_v48 }
 0x422   : > { %2633 = vmatprep.subr.msk.mxu1 %vm493_vm0, %v1328_v52 }
 0x424   : > { %2624 = vmatmul.mubr.msk.f32.vlgmr.msra.gmra.mxu1 %vm493_vm0, %v1113_v51 }
 0x425   : > { %2634 = vmatpush3.xpose.msk.msra.mxu1 %vm493_vm0, %v1328_v52  ;;  %2637 = vmatprep.mubr.msk.f32.mxu1 %vm493_vm0, %v1322_v53 }
 0x426   : > { %2635 = vmatprep.subr.msk.mxu1 %vm493_vm0, %v1326_v54 }
 0x429   : > { %2636 = vmatpush3.xpose.msk.msra.mxu1 %vm493_vm0, %v1326_v54 }
 0x42c   : > { %2638 = vmatmul.mubr.msk.f32.vlgmr.msra.gmra.mxu1 %vm493_vm0, %v1324_v55 }
 0x4dc   : > { %v3345_v56 = vpop.f32.mrf.mxu1 }
 0x4de   : > { %v3347_v57 = vpop.f32.mrf.mxu1 }
 0x4e4   : > { %v3349_v58 = vpop.f32.mrf.mxu1 }
 0x4e5   : > { %v1204_v5 = vsel %vm493_vm0, %v3349_v58, -inf }
 0x4e6   : > { %v3351_v59 = vpop.f32.mrf.mxu1 }
 0x4e7   : > { %v1201_v7 = vsel %vm493_vm0, %v3351_v59, -inf }
 0x4ec   : > { %v2639_v61 = vpop.f32.mrf.mxu1 }
 0x4ed   : > { %v1415_v62 = vsel %vm493_vm0, %v2639_v61, -inf }
 0x4ee   : > { %1416 = vmax.xlane.f32.xlu0 %v1415_v62  ;;  %v1403_v63 = vpop.f32.mrf.mxu1 }
 0x4ef   : > { %v1412_v0 = vsel %vm493_vm0, %v1403_v63, -inf }
 0x4f0   : > { %1413 = vmax.xlane.f32.xlu1 %v1412_v0 }
 0x501   : > { %1538 = vrot.lane.b32.xlu1 %v3231_v1, %s3031_s8 }
 0x504   : > { %1434 = vrot.lane.b32.xlu0 %v3243_v6, %s3030_s16 }
 0x505   : > { %1532 = vrot.lane.b32.xlu1 %v3227_v60, %s3031_s8 }
 0x508   : > { %1536 = vrot.lane.b32.xlu0 %v3233_v2, %s3031_s8 }
 0x50c   : > { %1534 = vrot.lane.b32.xlu0 %v3252_v9, %s3031_s8 }
 0x529   : > { %778 = vmax.xlane.f32.xlu1 %v777_v3 }
 0x52b   : > { %781 = vmax.xlane.f32.xlu0 %v780_v4 }
 0x52d   : > { %1205 = vmax.xlane.f32.xlu1 %v1204_v5 }
 0x52f   : > { %1202 = vmax.xlane.f32.xlu0 %v1201_v7 }
 0x53e   : > { %799 = vrot.lane.b32.xlu1 %v3249_v8, %s3027_s14 }
 0x542   : > { %1223 = vrot.lane.b32.xlu1 %v3243_v6, %s3029_s12 }
 0x545   : > { %801 = vrot.lane.b32.xlu0 %v3243_v6, %s3027_s14 }
 0x546   : > { %1645 = vrot.lane.b32.xlu1 %v3243_v6, %s3031_s8 }
 0x549   : > { %1221 = vrot.lane.b32.xlu0 %v3249_v8, %s3029_s12 }
 0x577   : > { %v1417_v11 = vpop.xlane.xlu0 %1416 }
 0x578   : > { %v1419_v12 = vsub.f32 %v2639_v61, %v1417_v11 }
 0x579   : > { %v1414_v13 = vpop.xlane.xlu1 %1413 }
 0x57a   : > { %v1418_v14 = vsub.f32 %v1403_v63, %v1414_v13  ;;  %v1422_v15 = vmul.f32 1.442695, %v1419_v12 }
 0x57b   : > { %v1435_v16 = vpop.permute.xlu0 %1434 }
 0x57c   : > { %v1420_v17 = vmul.f32 1.442695, %v1418_v14  ;;  %2640 = vmatprep.subr.mxu1 %v1435_v16 }
 0x57d   : > { %2641 = vmatpush3.msra.mxu1 %v1435_v16  ;;  %v1539_v18 = vpop.permute.xlu1 %1538 }
 0x57e   : > { %2813 = vpow2.f32 %v1420_v17  ;;  %2642 = vmatprep.subr.mxu1 %v1433_v10 }
 0x57f   : > { %2815 = vpow2.f32 %v1422_v15  ;;  %2643 = vmatpush3.msra.mxu1 %v1433_v10  ;;  %v1537_v22 = vpop.permute.xlu0 %1536 }
 0x580   : > { %2647 = vmatprep.subr.msk.mxu1 %vm493_vm0, %v1539_v18 }
 0x581   : > { %v1533_v21 = vpop.permute.xlu1 %1532 }
 0x583   : > { %v1535_v24 = vpop.permute.xlu0 %1534 }
 0x58b   : > { %v3384_v19 = vpop.eup %2813 }
 0x58c   : > { %v3386_v20 = vpop.eup %2815  ;;  %2644 = vmatprep.mubr.msk.f32.mxu1 %vm493_vm0, %v3384_v19 }
 0x58d   : > { %2645 = vmatmul.mubr.msk.f32.vlgmr.msra.gmra.mxu1 %vm493_vm0, %v3386_v20 }
 0x58e   : > { %2648 = vmatpush3.xpose.msk.msra.mxu1 %vm493_vm0, %v1539_v18  ;;  %2651 = vmatprep.mubr.msk.f32.mxu1 %vm493_vm0, %v1533_v21 }
 0x58f   : > { %2649 = vmatprep.subr.msk.mxu1 %vm493_vm0, %v1537_v22 }
 0x592   : > { %2650 = vmatpush3.xpose.msk.msra.mxu1 %vm493_vm0, %v1537_v22 }
 0x595   : > { %2652 = vmatmul.mubr.msk.f32.vlgmr.msra.gmra.mxu1 %vm493_vm0, %v1535_v24 }
 0x5b2   : > { %v779_v26 = vpop.xlane.xlu1 %778 }
 0x5b3   : > { %v783_v27 = vsub.f32 %v3303_v33, %v779_v26 }
 0x5b4   : > { %v782_v28 = vpop.xlane.xlu0 %781 }
 0x5b5   : > { %v785_v29 = vmul.f32 1.442695, %v783_v27  ;;  %v784_v34 = vsub.f32 %v3301_v32, %v782_v28 }
 0x5b6   : > { %v1206_v35 = vpop.xlane.xlu1 %1205 }
 0x5b7   : > { %2817 = vpow2.f32 %v785_v29  ;;  %v787_v36 = vmul.f32 1.442695, %v784_v34  ;;  %v1208_v37 = vsub.f32 %v3349_v58, %v1206_v35 }
 0x5b8   : > { %v1203_v38 = vpop.xlane.xlu0 %1202 }
 0x5b9   : > { %2819 = vpow2.f32 %v787_v36  ;;  %v1207_v39 = vsub.f32 %v3351_v59, %v1203_v38  ;;  %v1211_v40 = vmul.f32 1.442695, %v1208_v37 }
 0x5ba   : > { %v800_v41 = vpop.permute.xlu1 %799 }
 0x5bb   : > { %v1209_v42 = vmul.f32 1.442695, %v1207_v39 }
 0x5bc   : > { %v802_v43 = vpop.permute.xlu0 %801 }
 0x5bd   : > { %2821 = vpow2.f32 %v1209_v42  ;;  %2598 = vmatprep.subr.mxu0 %v802_v43 }
 0x5be   : > { %2823 = vpow2.f32 %v1211_v40  ;;  %2599 = vmatpush3.msra.mxu0 %v802_v43  ;;  %v1224_v33 = vpop.permute.xlu1 %1223 }
 0x5bf   : > { %2600 = vmatprep.subr.mxu0 %v800_v41 }
 0x5c0   : > { %2601 = vmatpush3.msra.mxu0 %v800_v41  ;;  %v1222_v45 = vpop.permute.xlu0 %1221 }
 0x5c1   : > { %2626 = vmatprep.subr.mxu0 %v1224_v33 }
 0x5c2   : > { %v1646_v47 = vpop.permute.xlu1 %1645 }
 0x5c4   : > { %v3401_v32 = vpop.eup %2817 }
 0x5c5   : > { %2602 = vmatprep.mubr.msk.f32.mxu0 %vm493_vm0, %v3401_v32 }
 0x5c6   : > { %v3405_v44 = vpop.eup %2819 }
 0x5c7   : > { %2603 = vmatmul.mubr.msk.f32.vlgmr.msra.gmra.mxu0 %vm493_vm0, %v3405_v44 }
 0x5c8   : > { %2627 = vmatpush3.msra.mxu0 %v1224_v33 }
 0x5c9   : > { %2628 = vmatprep.subr.mxu0 %v1222_v45 }
 0x5ca   : > { %v3409_v46 = vpop.eup %2821  ;;  %2629 = vmatpush3.msra.mxu0 %v1222_v45 }
 0x5cb   : > { %v3411_v48 = vpop.eup %2823  ;;  %2654 = vmatprep.subr.mxu0 %v1646_v47  ;;  %2630 = vmatprep.mubr.msk.f32.mxu0 %vm493_vm0, %v3409_v46 }
 0x5cc   : > { %2631 = vmatmul.mubr.msk.f32.vlgmr.msra.gmra.mxu0 %vm493_vm0, %v3411_v48 }
 0x5cd   : > { %2655 = vmatpush3.msra.mxu0 %v1646_v47 }
 0x64d   : > { %v3417_v51 = vpop.f32.mrf.mxu1 }
 0x64f   : > { %v3419_v52 = vpop.f32.mrf.mxu1 }
 0x655   : > { %v2653_v53 = vpop.f32.mrf.mxu1 }
 0x656   : > { %v1626_v54 = vsel %vm493_vm0, %v2653_v53, -inf }
 0x657   : > { %v1614_v55 = vpop.f32.mrf.mxu1  ;;  %1627 = vmax.xlane.f32.xlu1 %v1626_v54  ;;  %v792_v54 = vsel %vm493_vm0, %v3405_v44, 0.0 }
 0x658   : > { %v1623_v58 = vsel %vm493_vm0, %v1614_v55, -inf }
 0x659   : > { %1624 = vmax.xlane.f32.xlu0 %v1623_v58  ;;  %v1002_v58 = vsel %vm493_vm0, %v3326_v49, 0.0  ;;  %v1427_v49 = vsel %vm493_vm0, %v3386_v20, 0.0 }
 0x668   : > { %1749 = vrot.lane.b32.xlu1 %v3231_v1, %s3032_s9 }
 0x66c   : > { %1743 = vrot.lane.b32.xlu1 %v3227_v60, %s3032_s9 }
 0x66f   : > { %1643 = vrot.lane.b32.xlu0 %v3249_v8, %s3031_s8 }
 0x670   : > { %1854 = vrot.lane.b32.xlu1 %v3249_v8, %s3032_s9 }
 0x673   : > { %1747 = vrot.lane.b32.xlu0 %v3233_v2, %s3032_s9 }
 0x677   : > { %1745 = vrot.lane.b32.xlu0 %v3252_v9, %s3032_s9 }
 0x687   : > { %v3449_v14 = vpop.f32.mrf.mxu0 }
 0x689   : > { %v3451_v15 = vpop.f32.mrf.mxu0 }
 0x68c   : > { %v3453_v16 = vpop.f32.mrf.mxu0 }
 0x68e   : > { %v3455_v17 = vpop.f32.mrf.mxu0 }
 0x6e0   : > { %v1628_v59 = vpop.xlane.xlu1 %1627 }
 0x6e1   : > { %v1630_v61 = vsub.f32 %v2653_v53, %v1628_v59  ;;  %v1005_v59 = vsel %vm493_vm0, %v3328_v50, 0.0 }
 0x6e2   : > { %v1625_v62 = vpop.xlane.xlu0 %1624 }
 0x6e3   : > { %v1629_v63 = vsub.f32 %v1614_v55, %v1625_v62  ;;  %v1633_v0 = vmul.f32 1.442695, %v1630_v61  ;;  %v789_v55 = vsel %vm493_vm0, %v3401_v32, 0.0  ;;  %v1424_v32 = vsel %vm493_vm0, %v3384_v19, 0.0 }
 0x6e4   : > { %v1750_v5 = vpop.permute.xlu1 %1749 }
 0x6e5   : > { %v1631_v3 = vmul.f32 1.442695, %v1629_v63 }
 0x6e6   : > { %v1644_v4 = vpop.permute.xlu0 %1643 }
 0x6e7   : > { %2825 = vpow2.f32 %v1631_v3  ;;  %2656 = vmatprep.subr.mxu0 %v1644_v4 }
 0x6e8   : > { %2827 = vpow2.f32 %v1633_v0  ;;  %2657 = vmatpush3.msra.mxu0 %v1644_v4  ;;  %v1744_v11 = vpop.permute.xlu1 %1743 }
 0x6e9   : > { %2661 = vmatprep.subr.msk.mxu0 %vm493_vm0, %v1750_v5 }
 0x6ea   : > { %v1748_v12 = vpop.permute.xlu0 %1747 }
 0x6ec   : > { %v1855_v28 = vpop.permute.xlu1 %1854 }
 0x6ee   : > { %v1746_v13 = vpop.permute.xlu0 %1745 }
 0x6f4   : > { %v3436_v7 = vpop.eup %2825 }
 0x6f5   : > { %v3438_v10 = vpop.eup %2827  ;;  %2658 = vmatprep.mubr.msk.f32.mxu0 %vm493_vm0, %v3436_v7  ;;  %v1635_v50 = vsel %vm493_vm0, %v3436_v7, 0.0 }
 0x6f6   : > { %2659 = vmatmul.mubr.msk.f32.vlgmr.msra.gmra.mxu0 %vm493_vm0, %v3438_v10  ;;  %v1638_v44 = vsel %vm493_vm0, %v3438_v10, 0.0 }
 0x6f7   : > { %2662 = vmatpush3.xpose.msk.msra.mxu0 %vm493_vm0, %v1750_v5  ;;  %2665 = vmatprep.mubr.msk.f32.mxu0 %vm493_vm0, %v1744_v11 }
 0x6f8   : > { %2663 = vmatprep.subr.msk.mxu0 %vm493_vm0, %v1748_v12 }
 0x6fb   : > { %2664 = vmatpush3.xpose.msk.msra.mxu0 %vm493_vm0, %v1748_v12  ;;  %v596_v12 = vsel %vm493_vm0, %v3282_v25, 0.0 }
 0x6fe   : > { %2666 = vmatmul.mubr.msk.f32.vlgmr.msra.gmra.mxu0 %vm493_vm0, %v1746_v13  ;;  %v593_v13 = vsel %vm493_vm0, %v3278_v23, 0.0 }
 0x7b6   : > { %v3457_v18 = vpop.f32.mrf.mxu0 }
 0x7b8   : > { %v3459_v21 = vpop.f32.mrf.mxu0 }
 0x7be   : > { %v2667_v22 = vpop.f32.mrf.mxu0 }
 0x7bf   : > { %v1837_v24 = vsel %vm493_vm0, %v2667_v22, -inf }
 0x7c0   : > { %1838 = vmax.xlane.f32.xlu0 %v1837_v24  ;;  %v1825_v26 = vpop.f32.mrf.mxu0 }
 0x7c1   : > { %v1834_v27 = vsel %vm493_vm0, %v1825_v26, -inf }
 0x7c2   : > { %1835 = vmax.xlane.f32.xlu1 %v1834_v27 }
 0x7d3   : > { %1960 = vrot.lane.b32.xlu1 %v3231_v1, %s3033_s30 }
 0x7d6   : > { %1856 = vrot.lane.b32.xlu0 %v3243_v6, %s3032_s9 }
 0x7d7   : > { %1954 = vrot.lane.b32.xlu1 %v3227_v60, %s3033_s30 }
 0x7da   : > { %1958 = vrot.lane.b32.xlu0 %v3233_v2, %s3033_s30 }
 0x7de   : > { %1956 = vrot.lane.b32.xlu0 %v3252_v9, %s3033_s30 }
 0x849   : > { %v1839_v29 = vpop.xlane.xlu0 %1838 }
 0x84a   : > { %v1841_v34 = vsub.f32 %v2667_v22, %v1839_v29 }
 0x84b   : > { %v1836_v35 = vpop.xlane.xlu1 %1835 }
 0x84c   : > { %v1840_v36 = vsub.f32 %v1825_v26, %v1836_v35  ;;  %v1844_v37 = vmul.f32 1.442695, %v1841_v34 }
 0x84d   : > { %v1857_v38 = vpop.permute.xlu0 %1856 }
 0x84e   : > { %v1842_v1 = vmul.f32 1.442695, %v1840_v36  ;;  %2668 = vmatprep.subr.mxu1 %v1857_v38 }
 0x84f   : > { %2669 = vmatpush3.msra.mxu1 %v1857_v38  ;;  %v1961_v60 = vpop.permute.xlu1 %1960 }
 0x850   : > { %2829 = vpow2.f32 %v1842_v1  ;;  %2670 = vmatprep.subr.mxu1 %v1855_v28 }
 0x851   : > { %2831 = vpow2.f32 %v1844_v37  ;;  %2671 = vmatpush3.msra.mxu1 %v1855_v28  ;;  %v1959_v40 = vpop.permute.xlu0 %1958 }
 0x852   : > { %2675 = vmatprep.subr.msk.mxu1 %vm493_vm0, %v1961_v60 }
 0x853   : > { %v1955_v9 = vpop.permute.xlu1 %1954 }
 0x855   : > { %v1957_v41 = vpop.permute.xlu0 %1956 }
 0x85d   : > { %v2830_v2 = vpop.eup %2829 }
 0x85e   : > { %v2832_v39 = vpop.eup %2831  ;;  %2672 = vmatprep.mubr.msk.f32.mxu1 %vm493_vm0, %v2830_v2 }
 0x85f   : > { %2673 = vmatmul.mubr.msk.f32.vlgmr.msra.gmra.mxu1 %vm493_vm0, %v2832_v39 }
 0x860   : > { %2676 = vmatpush3.xpose.msk.msra.mxu1 %vm493_vm0, %v1961_v60  ;;  %2679 = vmatprep.mubr.msk.f32.mxu1 %vm493_vm0, %v1955_v9 }
 0x861   : > { %2677 = vmatprep.subr.msk.mxu1 %vm493_vm0, %v1959_v40 }
 0x864   : > { %2678 = vmatpush3.xpose.msk.msra.mxu1 %vm493_vm0, %v1959_v40 }
 0x867   : > { %2680 = vmatmul.mubr.msk.f32.vlgmr.msra.gmra.mxu1 %vm493_vm0, %v1957_v41 }
 0x91f   : > { %v3481_v42 = vpop.f32.mrf.mxu1 }
 0x921   : > { %v3483_v43 = vpop.f32.mrf.mxu1 }
 0x927   : > { %v2681_v33 = vpop.f32.mrf.mxu1 }
 0x928   : > { %v2048_v45 = vsel %vm493_vm0, %v2681_v33, -inf }
 0x929   : > { %2049 = vmax.xlane.f32.xlu0 %v2048_v45  ;;  %v2036_v47 = vpop.f32.mrf.mxu1 }
 0x92a   : > { %v2045_v53 = vsel %vm493_vm0, %v2036_v47, -inf }
 0x92b   : > { %2046 = vmax.xlane.f32.xlu1 %v2045_v53 }
 0x93c   : > { %2065 = vrot.lane.b32.xlu1 %v3249_v8, %s3033_s30  ;;  %v1213_v8 = vsel %vm493_vm0, %v3409_v46, 0.0  ;;  %v1846_v46 = vsel %vm493_vm0, %v2830_v2, 0.0 }
 0x93f   : > { %2067 = vrot.lane.b32.xlu0 %v3243_v6, %s3033_s30  ;;  %v1216_v6 = vsel %vm493_vm0, %v3411_v48, 0.0  ;;  %v1849_v48 = vsel %vm493_vm0, %v2832_v39, 0.0 }
 0x95e   : > { %793 = vadd.xlane.f32.xlu0 %v792_v54 }
 0x960   : > { %790 = vadd.xlane.f32.xlu1 %v789_v55 }
 0x962   : > { %1003 = vadd.xlane.f32.xlu0 %v1002_v58 }
 0x964   : > { %1006 = vadd.xlane.f32.xlu1 %v1005_v59 }
 0x966   : > { %1214 = vadd.xlane.f32.xlu0 %v1213_v8  ;;  %v2182_v8 = vld [vmem:[#allocation8 + $0x78] sm:$0xff] }
 0x968   : > { %1217 = vadd.xlane.f32.xlu1 %v1216_v6  ;;  %v2181_v6 = vld [vmem:[#allocation8 + $0x70] sm:$0xff] }
 0x96a   : > { %1425 = vadd.xlane.f32.xlu0 %v1424_v32  ;;  %v2178_v32 = vld [vmem:[#allocation8 + $0x58] sm:$0xff] }
 0x96c   : > { %1428 = vadd.xlane.f32.xlu1 %v1427_v49  ;;  %v2176_v49 = vld [vmem:[#allocation8 + $0x48] sm:$0xff] }
 0x96e   : > { %1636 = vadd.xlane.f32.xlu0 %v1635_v50  ;;  %v2174_v50 = vld [vmem:[#allocation8 + $0x38] sm:$0xff] }
 0x970   : > { %1639 = vadd.xlane.f32.xlu1 %v1638_v44  ;;  %v2173_v44 = vld [vmem:[#allocation8 + $0x30] sm:$0xff] }
 0x972   : > { %1847 = vadd.xlane.f32.xlu0 %v1846_v46  ;;  %v2172_v46 = vld [vmem:[#allocation8 + $0x28] sm:$0xff] }
 0x974   : > { %1850 = vadd.xlane.f32.xlu1 %v1849_v48 }
 0x9b2   : > { %v2050_v19 = vpop.xlane.xlu0 %2049 }
 0x9b3   : > { %v2052_v61 = vsub.f32 %v2681_v33, %v2050_v19 }
 0x9b4   : > { %v2047_v62 = vpop.xlane.xlu1 %2046 }
 0x9b5   : > { %v2055_v63 = vmul.f32 1.442695, %v2052_v61  ;;  %v2051_v20 = vsub.f32 %v2036_v47, %v2047_v62 }
 0x9b6   : > { %v2068_v0 = vpop.permute.xlu0 %2067 }
 0x9b7   : > { %2833 = vpow2.f32 %v2055_v63  ;;  %v2053_v3 = vmul.f32 1.442695, %v2051_v20  ;;  %2682 = vmatprep.subr.mxu0 %v2068_v0 }
 0x9b8   : > { %2683 = vmatpush3.msra.mxu0 %v2068_v0  ;;  %v2066_v4 = vpop.permute.xlu1 %2065 }
 0x9b9   : > { %2835 = vpow2.f32 %v2053_v3  ;;  %2684 = vmatprep.subr.mxu0 %v2066_v4 }
 0x9ba   : > { %2685 = vmatpush3.msra.mxu0 %v2066_v4 }
 0x9bb   : > { %2689 = vmatprep.subr.mxu0 %v2182_v8 }
 0x9c4   : > { %v2834_v5 = vpop.eup %2833 }
 0x9c5   : > { %v2060_v7 = vsel %vm493_vm0, %v2834_v5, 0.0 }
 0x9c6   : > { %v2836_v10 = vpop.eup %2835  ;;  %2061 = vadd.xlane.f32.xlu1 %v2060_v7 }
 0x9c7   : > { %2686 = vmatprep.mubr.msk.f32.mxu0 %vm493_vm0, %v2836_v10  ;;  %v2057_v11 = vsel %vm493_vm0, %v2836_v10, 0.0 }
 0x9c8   : > { %2058 = vadd.xlane.f32.xlu0 %v2057_v11  ;;  %2687 = vmatmul.mubr.msk.f32.vlgmr.msra.gmra.mxu0 %vm493_vm0, %v2834_v5 }
 0x9c9   : > { %2690 = vmatpush3.msra.mxu0 %v2182_v8 }
 0x9ca   : > { %597 = vadd.xlane.f32.xlu1 %v596_v12  ;;  %2691 = vmatprep.subr.mxu0 %v2181_v6 }
 0x9cb   : > { %2692 = vmatpush3.msra.mxu0 %v2181_v6 }
 0x9cc   : > { %594 = vadd.xlane.f32.xlu0 %v593_v13 }
 0x9e7   : > { %v794_v22 = vpop.xlane.xlu0 %793 }
 0x9e8   : > { %2837 = vrcp.f32 %v794_v22 }
 0x9e9   : > { %v791_v24 = vpop.xlane.xlu1 %790 }
 0x9ea   : > { %2839 = vrcp.f32 %v791_v24 }
 0x9eb   : > { %v1004_v26 = vpop.xlane.xlu0 %1003 }
 0x9ec   : > { %2841 = vrcp.f32 %v1004_v26  ;;  %v2171_v26 = vld [vmem:[#allocation8 + $0x20] sm:$0xff] }
 0x9ed   : > { %v1007_v27 = vpop.xlane.xlu1 %1006 }
 0x9ee   : > { %2843 = vrcp.f32 %v1007_v27 }
 0x9ef   : > { %v1215_v28 = vpop.xlane.xlu0 %1214 }
 0x9f0   : > { %2845 = vrcp.f32 %v1215_v28  ;;  %v2170_v28 = vld [vmem:[#allocation8 + $0x18] sm:$0xff] }
 0x9f1   : > { %v1218_v29 = vpop.xlane.xlu1 %1217 }
 0x9f2   : > { %2847 = vrcp.f32 %v1218_v29  ;;  %v2169_v29 = vld [vmem:[#allocation8 + $0x10] sm:$0xff] }
 0x9f3   : > { %v1426_v34 = vpop.xlane.xlu0 %1425 }
 0x9f4   : > { %2849 = vrcp.f32 %v1426_v34  ;;  %v2168_v34 = vld [vmem:[#allocation8 + $0x8] sm:$0xff] }
 0x9f5   : > { %v2838_v25 = vpop.eup %2837  ;;  %v1429_v35 = vpop.xlane.xlu1 %1428 }
 0x9f6   : > { %2851 = vrcp.f32 %v1429_v35  ;;  %v887_v23 = vmul.f32 %v2838_v25, %v3449_v14  ;;  %v2167_v25 = vld [vmem:[#allocation8] sm:$0xff] }
 0x9f7   : > { %v2840_v36 = vpop.eup %2839  ;;  %v1637_v37 = vpop.xlane.xlu0 %1636 }
 0x9f8   : > { %2853 = vrcp.f32 %v1637_v37  ;;  %892 = vrot.lane.b32.xlu1 %v887_v23, %s3033_s30  ;;  %v886_v38 = vmul.f32 %v2840_v36, %v3451_v15 }
 0x9f9   : > { %v2842_v1 = vpop.eup %2841  ;;  %v1640_v60 = vpop.xlane.xlu1 %1639 }
 0x9fa   : > { %2855 = vrcp.f32 %v1640_v60  ;;  %890 = vrot.lane.b32.xlu0 %v886_v38, %s3033_s30  ;;  %v1097_v2 = vmul.f32 %v2842_v1, %v3347_v57 }
 0x9fb   : > { %v2844_v39 = vpop.eup %2843  ;;  %v1848_v9 = vpop.xlane.xlu0 %1847 }
 0x9fc   : > { %2857 = vrcp.f32 %v1848_v9  ;;  %1101 = vrot.lane.b32.xlu1 %v1097_v2, %s3032_s9  ;;  %v1098_v14 = vmul.f32 %v2844_v39, %v3345_v56 }
 0x9fd   : > { %v2846_v40 = vpop.eup %2845  ;;  %v1851_v41 = vpop.xlane.xlu1 %1850 }
 0x9fe   : > { %2859 = vrcp.f32 %v1851_v41  ;;  %1103 = vrot.lane.b32.xlu0 %v1098_v14, %s3032_s9  ;;  %v1308_v15 = vmul.f32 %v2846_v40, %v3455_v17  ;;  %v2434_v14 = vld [vmem:[%s3609_s4] ss:$0 sm:$0xff] }
 0x9ff   : > { %v2848_v33 = vpop.eup %2847 }
 0xa00   : > { %1312 = vrot.lane.b32.xlu1 %v1308_v15, %s3031_s8  ;;  %v1309_v45 = vmul.f32 %v2848_v33, %v3453_v16 }
 0xa01   : > { %v2850_v57 = vpop.eup %2849 }
 0xa02   : > { %1314 = vrot.lane.b32.xlu0 %v1309_v45, %s3031_s8  ;;  %v1519_v47 = vmul.f32 %v2850_v57, %v3419_v52 }
 0xa03   : > { %v2852_v53 = vpop.eup %2851 }
 0xa04   : > { %1523 = vrot.lane.b32.xlu1 %v1519_v47, %s3030_s16  ;;  %v1520_v56 = vmul.f32 %v2852_v53, %v3417_v51 }
 0xa05   : > { %v2854_v54 = vpop.eup %2853 }
 0xa06   : > { %1525 = vrot.lane.b32.xlu0 %v1520_v56, %s3030_s16  ;;  %v1730_v17 = vmul.f32 %v2854_v54, %v3459_v21  ;;  %v2180_v21 = vld [vmem:[#allocation8 + $0x68] sm:$0xff] }
 0xa07   : > { %v2856_v55 = vpop.eup %2855  ;;  %2693 = vmatprep.subr.mxu0 %v2180_v21 }
 0xa08   : > { %1734 = vrot.lane.b32.xlu1 %v1730_v17, %s3029_s12  ;;  %v1731_v16 = vmul.f32 %v2856_v55, %v3457_v18  ;;  %v2179_v18 = vld [vmem:[#allocation8 + $0x60] sm:$0xff]  ;;  %2694 = vmatpush3.msra.mxu0 %v2180_v21 }
 0xa09   : > { %v2858_v58 = vpop.eup %2857  ;;  %2695 = vmatprep.subr.mxu0 %v2179_v18 }
 0xa0a   : > { %1736 = vrot.lane.b32.xlu0 %v1731_v16, %s3029_s12  ;;  %v1941_v52 = vmul.f32 %v2858_v58, %v3483_v43  ;;  %2696 = vmatpush3.msra.mxu0 %v2179_v18  ;;  %v2177_v43 = vld [vmem:[#allocation8 + $0x50] sm:$0xff]  ;;  %s2953_s12 = sshll.u32 %s3034_s22, 4  ;;  %s2954_s12 = int_to_ptr.vmem [resolvable:$false] %s2953_s12 }
 0xa0b   : > { %v2860_v59 = vpop.eup %2859  ;;  %2697 = vmatprep.subr.mxu0 %v2178_v32  ;;  %s2955_s16 = scalar_lea.vmem %s2954_s12, 512  ;;  %p2956_p6 = scmp.lt.s32.totalorder %s3557_s7, %s2954_s12 }
 0xa0c   : > { %1945 = vrot.lane.b32.xlu1 %v1941_v52, %s3028_s10  ;;  %v1942_v51 = vmul.f32 %v2860_v59, %v3481_v42  ;;  %2698 = vmatpush3.msra.mxu0 %v2178_v32  ;;  %v2175_v42 = vld [vmem:[#allocation8 + $0x40] sm:$0xff]  ;;  %p2957_p12 = scmp.lt.s32.totalorder %s2955_s16, %s2949_s13 }
 0xa0d   : > { %2699 = vmatprep.subr.mxu0 %v2177_v43 }
 0xa0e   : > { %1947 = vrot.lane.b32.xlu0 %v1942_v51, %s3028_s10  ;;  %2700 = vmatpush3.msra.mxu0 %v2177_v43  ;;  %s2268_s10 = scalar_lea.sflag [#allocation5], %s3200_s6  ;;  %p2958_p3 = por %p2957_p12, %p2956_p6 }
 0xa0f   : > { %2701 = vmatprep.subr.mxu0 %v2176_v49 }
 0xa10   : > { %2702 = vmatpush3.msra.mxu0 %v2176_v49  ;;  %p2959_p9 = pnand %p2958_p3, %p2952_p2 }
 0xa11   : > { %2703 = vmatprep.subr.mxu0 %v2175_v42 }
 0xa12   : > { %2704 = vmatpush3.msra.mxu0 %v2175_v42 }
 0xa13   : > { %2705 = vmatprep.subr.mxu0 %v2174_v50 }
 0xa14   : > { %2706 = vmatpush3.msra.mxu0 %v2174_v50 }
 0xa15   : > { %2707 = vmatprep.subr.mxu0 %v2173_v44 }
 0xa16   : > { %2708 = vmatpush3.msra.mxu0 %v2173_v44 }
 0xa17   : > { %2709 = vmatprep.subr.mxu0 %v2172_v46 }
 0xa18   : > { %2710 = vmatpush3.msra.mxu0 %v2172_v46 }
 0xa19   : > { %2711 = vmatprep.subr.mxu0 %v2171_v26 }
 0xa1a   : > { %2712 = vmatpush3.msra.mxu0 %v2171_v26 }
 0xa1b   : > { %2713 = vmatprep.subr.mxu0 %v2170_v28 }
 0xa1c   : > { %2714 = vmatpush3.msra.mxu0 %v2170_v28 }
 0xa1d   : > { %2715 = vmatprep.subr.mxu0 %v2169_v29 }
 0xa1e   : > { %2716 = vmatpush3.msra.mxu0 %v2169_v29 }
 0xa1f   : > { %2717 = vmatprep.subr.mxu0 %v2168_v34 }
 0xa20   : > { %2718 = vmatpush3.msra.mxu0 %v2168_v34 }
 0xa21   : > { %2719 = vmatprep.subr.mxu0 %v2167_v25 }
 0xa22   : > { %2720 = vmatpush3.msra.mxu0 %v2167_v25 }
 0xa4f   : > { %v2062_v48 = vpop.xlane.xlu1 %2061 }
 0xa51   : > { %v2059_v19 = vpop.xlane.xlu0 %2058 }
 0xa53   : > { %v598_v61 = vpop.xlane.xlu1 %597 }
 0xa54   : > { %2861 = vrcp.f32 %v598_v61 }
 0xa55   : > { %v595_v62 = vpop.xlane.xlu0 %594 }
 0xa56   : > { %2863 = vrcp.f32 %v595_v62 }
 0xa57   : > { %2865 = vrcp.f32 %v2062_v48 }
 0xa58   : > { %2867 = vrcp.f32 %v2059_v19 }
 0xa61   : > { %v2862_v63 = vpop.eup %2861 }
 0xa62   : > { %v683_v20 = vmul.f32 %v2862_v63, %v3297_v30 }
 0xa63   : > { %v2864_v0 = vpop.eup %2863 }
 0xa64   : > { %685 = vst.msk [vmem:[#allocation2 + $0x8] sm:$0xff] %vm493_vm0, %v683_v20  ;;  %v682_v3 = vmul.f32 %v2864_v0, %v3299_v31  ;;  %v2866_v35 = vpop.eup %2865 }
 0xa65   : > { %v2868_v37 = vpop.eup %2867 }
 0xa66   : > { %684 = vst.msk [vmem:[#allocation2] sm:$0xff] %vm493_vm0, %v682_v3 }
 0xa6a   : > { %v893_v4 = vpop.permute.xlu1 %892 }
 0xa6b   : > { %898 = vst.msk [vmem:[#allocation2 + $0x8] sm:$0xff] %vm896_vm1, %v893_v4 }
 0xa6c   : > { %v891_v5 = vpop.permute.xlu0 %890 }
 0xa6d   : > { %897 = vst.msk [vmem:[#allocation2] sm:$0xff] %vm896_vm1, %v891_v5 }
 0xa6e   : > { %v1102_v7 = vpop.permute.xlu1 %1101 }
 0xa6f   : > { %1108 = vst.msk [vmem:[#allocation2] sm:$0xff] %vm1107_vm2, %v1102_v7 }
 0xa70   : > { %v1104_v10 = vpop.permute.xlu0 %1103 }
 0xa71   : > { %1109 = vst.msk [vmem:[#allocation2 + $0x8] sm:$0xff] %vm1107_vm2, %v1104_v10 }
 0xa72   : > { %v1313_v11 = vpop.permute.xlu1 %1312 }
 0xa73   : > { %1319 = vst.msk [vmem:[#allocation2] sm:$0xff] %vm1318_vm3, %v1313_v11 }
 0xa74   : > { %v1315_v30 = vpop.permute.xlu0 %1314 }
 0xa75   : > { %1320 = vst.msk [vmem:[#allocation2 + $0x8] sm:$0xff] %vm1318_vm3, %v1315_v30 }
 0xa76   : > { %v1524_v12 = vpop.permute.xlu1 %1523 }
 0xa77   : > { %1530 = vst.msk [vmem:[#allocation2] sm:$0xff] %vm1529_vm4, %v1524_v12 }
 0xa78   : > { %v1526_v31 = vpop.permute.xlu0 %1525 }
 0xa79   : > { %1531 = vst.msk [vmem:[#allocation2 + $0x8] sm:$0xff] %vm1529_vm4, %v1526_v31 }
 0xa7a   : > { %v1735_v13 = vpop.permute.xlu1 %1734 }
 0xa7b   : > { %1741 = vst.msk [vmem:[#allocation2] sm:$0xff] %vm1740_vm5, %v1735_v13 }
 0xa7c   : > { %v1737_v22 = vpop.permute.xlu0 %1736 }
 0xa7d   : > { %1742 = vst.msk [vmem:[#allocation2 + $0x8] sm:$0xff] %vm1740_vm5, %v1737_v22 }
 0xa7e   : > { %v1946_v24 = vpop.permute.xlu1 %1945 }
 0xa7f   : > { %1952 = vst.msk [vmem:[#allocation2] sm:$0xff] %vm1951_vm6, %v1946_v24 }
 0xa80   : > { %v1948_v27 = vpop.permute.xlu0 %1947 }
 0xa81   : > { %1953 = vst.msk [vmem:[#allocation2 + $0x8] sm:$0xff] %vm1951_vm6, %v1948_v27 }
 0xa88   : > { %v2688_v23 = vpop.f32.mrf.mxu0 }
 0xa89   : > { %v2153_v36 = vmul.f32 %v2866_v35, %v2688_v23 }
 0xa8a   : > { %v2143_v38 = vpop.f32.mrf.mxu0 }
 0xa8b   : > { %v2152_v1 = vmul.f32 %v2868_v37, %v2143_v38  ;;  %2158 = vrot.lane.b32.xlu0 %v2153_v36, %s3027_s14 }
 0xa8d   : > { %2156 = vrot.lane.b32.xlu1 %v2152_v1, %s3027_s14  ;;  %s3562_s14 = scalar_lea.hbm %s3610_s5, %s2441_s15 }
 0xafd   : > { %v2159_v60 = vpop.permute.xlu0 %2158 }
 0xafe   : > { %2164 = vst.msk [vmem:[#allocation2 + $0x8] sm:$0xff] %vm2162_vm7, %v2159_v60 }
 0xaff   : > { %v2157_v2 = vpop.permute.xlu1 %2156 }
 0xb00   : > { %2163 = vst.msk [vmem:[#allocation2] sm:$0xff] %vm2162_vm7, %v2157_v2 }
 0xb05   : > { %v2166_v9 = vld [vmem:[#allocation2 + $0x8] sm:$0xff] }
 0xb07   : > { %v2165_v39 = vld [vmem:[#allocation2] sm:$0xff] }
 0xb08   : > { %2721 = vmatprep.mubr.f32.mxu0 %v2165_v39 }
 0xb09   : > { %2722 = vmatmul.mubr.f32.vlgmr.msra.gmra.mxu0 %v2166_v9 }
 0xbc9   : > { %v2723_v40 = vpop.f32.mrf.mxu0 }
 0xbca   : > { %v2262_v41 = vadd.f32 %v2723_v40, %v2434_v14 }
 0xbcb   : > { %v2256_v15 = vpop.f32.mrf.mxu0 }
 0xbcc   : > { %2266 = vst [vmem:[%s271_s23 + $0x8] sm:$0xff] %v2262_v41  ;;  %v2257_v33 = vadd.f32 %v2434_v14, %v2256_v15 }
 0xbce   : > { %2265 = vst [vmem:[%s271_s23] sm:$0xff] %v2257_v33 }
 0xbcf   : > { %2962 = shalt.err (!%p2959_p9)
}
 0xbd0   : > { %s2963_s8 = scalar_lea.hbm %s3562_s14, 256  ;;  %s2967_s11 = scalar_lea.hbm %s3610_s5, 512 }
 0xbd1   : > { %p2964_p13 = scmp.ne.s32.totalorder %s3562_s14, %s2963_s8  ;;  %p2968_p4 = scmp.lt.s32.totalorder %s3562_s14, %s3610_s5 }
 0xbd2   : > { %p2969_p8 = scmp.lt.s32.totalorder %s2967_s11, %s2963_s8 }
 0xbd3   : > { %p2965_p5 = pnand %p2964_p13, %p3628_p10 }
 0xbd4   : > { %p2970_p7 = por %p2969_p8, %p2968_p4 }
 0xbd5   : > { %p2966_p0 = pneg %p2965_p5 }
 0xbd7   : > { %p2971_p11 = pnand %p2970_p7, %p2966_p0 }
 0xbd9   : > { %2974 = shalt.err (!%p2971_p11)
}
 0xbda   : > { %s3035_s15 = smov 128   ;;  %s3036_s24 = smov 8  }
 0xbdb   : > { %2734 = dma.vmem_to_hbm [thread:$0]  (%p3628_p10), %s3557_s7, 256, %s3562_s14, %s2268_s10, %s3035_s15, %s3035_s15, %s3036_s24  }
 0xbdc PF: > { %s2296_s26 = sand.u32 1, %s3005_s18   ;;  %p3629_p1 = scmp.ne.s32.totalorder %s3617_s25, 0 }
 0xbdd   : > { %p3630_p2 = scmp.ge.s32.totalorder %s3017_s21, 2  ;;  %s2297_s13 = scalar_lea.sflag [#allocation5], %s2296_s26 }
 0xbdf   : > { %p2748_p6 = pnand %p3630_p2, %p3629_p1 }
 0xbe1   : > { %p2749_p12 = pneg %p2748_p6 }
 0xbe3   : > { %3000 = dma.done.wait (%p2749_p12), %s2297_s13, 256  }
 0xbe4   : > { %3002 = vsyncadd (%p2749_p12), %s2297_s13, 4294967040  ;;  %p19_p3 = scmp.ge.s32.totalorder %s3142_s17, 4   ;;  %s3631_s18 = smov %s3009_s19 }
 0xbe5   : > { %s3632_s19 = smov %s3013_s20  ;;  %s3633_s20 = smov %s3151_s28 }
 0xbe6   : > { %s3634_s21 = smov %s3142_s17  ;;  %21 = sbr.rel (!%p19_p3) target bundleno = 6 (0x6), region = 93 }
 0xbeb   :  { %2302 = vsyncpa [#allocation4], 1 }
 0xbec   :  { %2304 = vsyncpa [#allocation4 + $0x1], 1 }
 0xbed   :  { %2305 = vsyncpa [#allocation7], 1 }
 0xbee   :  { %2306 = vsyncpa [#allocation5], 1 }
 0xbef   :  { %2308 = vsyncpa [#allocation5 + $0x1], 1 }

</bundles_post_ra>
